<compile_context>
chip_gen: v5e
topology: v5e:2x2
jax: 0.10.0
libtpu: 0.0.40
codegen_flags: <defaults>
</compile_context>

<pallas_src>
import numpy as np
import jax
import jax.numpy as jnp
from jax.experimental import pallas as pl
from jax.experimental.pallas import tpu as pltpu

HIDDEN_DIM = 64
DEFAULT_ROW_TILE = 4096            # rows of M processed per grid step (clamped to M)
VMEM_LIMIT_BYTES = 48 * 1024 * 1024  # fits v7x (64 MiB phys) with headroom; raises v5e's 16 MiB default


def _softplus(x):
    # Numerically-stable softplus with Mosaic-safe primitives (no log1p):
    #   softplus(x) = max(x, 0) + log(1 + exp(-|x|))
    return jnp.maximum(x, 0.0) + jnp.log(1.0 + jnp.exp(-jnp.abs(x)))


def _osg_decoder_kernel(feat_ref,
                        w1_ref, b1_ref, w2_ref, b2_ref, w3_ref, b3_ref,
                        ws_ref, bs_ref, wr_ref, br_ref,
                        rgb_ref, sigma_ref):
    """Fused OSGDecoder forward on one (P, tm, C) tile of sampled_features.

    feat_ref  : VMEM (P, tm, C), native input dtype
    w1_ref    : VMEM (64, C)  = (W1_eff / P)^T, input dtype (mean over planes folded in)
    b1_ref    : VMEM (64, 1)  f32
    w2_ref    : VMEM (64, 64) = W2_eff^T, f32        b2_ref: (64, 1)
    w3_ref    : VMEM (64, 64) = W3_eff^T, f32        b3_ref: (64, 1)
    ws_ref    : VMEM (1, 64)  sigma row of W4_eff^T  bs_ref: (1, 1)
    wr_ref    : VMEM (64, R)  rgb columns of W4_eff  br_ref: (1, R)
    rgb_ref   : VMEM (tm, R)
    sigma_ref : VMEM (1, tm)   (channel-major, lane-dense)
    """
    # --- layer 1: tri-plane mean folded into per-plane MXU dots (transposed output) ---
    # h1T[h, m] = sum_p sum_c (W1_eff/P)[c, h] * feat_p[m, c]
    w1 = w1_ref[...]
    acc = jnp.einsum('hc,mc->hm', w1, feat_ref[0],
                     preferred_element_type=jnp.float32)
    for p in range(1, feat_ref.shape[0]):
        acc = acc + jnp.einsum('hc,mc->hm', w1, feat_ref[p],
                               preferred_element_type=jnp.float32)
    h = _softplus(acc + b1_ref[...])                                       # (64, tm)

    # --- layers 2/3: plain dots, activations stay lane-dense (64, tm) ---
    h = _softplus(jnp.dot(w2_ref[...], h,
                          preferred_element_type=jnp.float32) + b2_ref[...])
    h = _softplus(jnp.dot(w3_ref[...], h,
                          preferred_element_type=jnp.float32) + b3_ref[...])

    # --- sigma head: (1, 64) @ (64, tm) -> (1, tm), lane-dense store ---
    sigma_t = jnp.dot(ws_ref[...], h,
                      preferred_element_type=jnp.float32) + bs_ref[...]    # (1, tm)
    sigma_ref[...] = sigma_t.astype(sigma_ref.dtype)

    # --- rgb head: back to row-major via one A^T.B contraction -> (tm, R) ---
    y = jnp.einsum('hm,hr->mr', h, wr_ref[...],
                   preferred_element_type=jnp.float32) + br_ref[...]       # (tm, R)
    scale = 1.0 + 2.0 * 0.001
    # sigmoid(y)*scale - 0.001 == 0.5*scale*tanh(y/2) + (0.5*scale - 0.001)  (EUP tanh, no divide)
    rgb = (0.5 * scale) * jnp.tanh(0.5 * y) + (0.5 * scale - 0.001)
    rgb_ref[...] = rgb.astype(rgb_ref.dtype)


def osg_decoder_forward(sampled_features, weights, biases, *, row_tile=DEFAULT_ROW_TILE):
    """sampled_features: (N, P, M, C). weights/biases: 4 effective row-major FC params each."""
    N, P, M, C = sampled_features.shape
    out_total = weights[-1].shape[1]          # 1 + decoder_output_dim
    rgb_dim = out_total - 1
    dtype = sampled_features.dtype

    # row tile: full M if small (always legal), else a multiple of 128
    tm = M if M <= row_tile else row_tile
    grid = (N, pl.cdiv(M, tm))

    # Tiny parameter plumbing (<= 64x64 tensors): transpose for lane-dense activations,
    # fold the 1/P of the tri-plane mean into the first layer, split the head so the
    # kernel never lane-slices the big activation tile.
    w1 = (jnp.transpose(weights[0]) * (1.0 / P)).astype(dtype)   # (64, C)
    b1 = jnp.transpose(biases[0])                                # (64, 1)
    w2 = jnp.transpose(weights[1])                               # (64, 64)
    b2 = jnp.transpose(biases[1])
    w3 = jnp.transpose(weights[2])
    b3 = jnp.transpose(biases[2])
    ws = jnp.transpose(weights[3][:, :1])                        # (1, 64)  sigma row
    bs = biases[3][:, :1]                                        # (1, 1)
    wr = weights[3][:, 1:]                                       # (64, R)  rgb block (row-major)
    br = biases[3][:, 1:]                                        # (1, R)

    def w_spec(w):
        return pl.BlockSpec(w.shape, lambda n, m: (0,) * w.ndim)  # resident, never re-DMA'd

    rgb, sigma_cm = pl.pallas_call(
        _osg_decoder_kernel,
        out_shape=(jax.ShapeDtypeStruct((N, M, rgb_dim), dtype),
                   jax.ShapeDtypeStruct((N, 1, M), dtype)),
        grid=grid,
        in_specs=[
            # leading None => batch dim squeezed: kernel sees (P, tm, C)
            pl.BlockSpec((None, P, tm, C), lambda n, m: (n, 0, m, 0)),
            w_spec(w1), w_spec(b1),
            w_spec(w2), w_spec(b2),
            w_spec(w3), w_spec(b3),
            w_spec(ws), w_spec(bs),
            w_spec(wr), w_spec(br),
        ],
        out_specs=(
            pl.BlockSpec((None, tm, rgb_dim), lambda n, m: (n, m, 0)),
            pl.BlockSpec((None, 1, tm), lambda n, m: (n, 0, m)),
        ),
        compiler_params=pltpu.CompilerParams(
            dimension_semantics=("parallel", "parallel"),
            vmem_limit_bytes=VMEM_LIMIT_BYTES),
    )(sampled_features, w1, b1, w2, b2, w3, b3, ws, bs, wr, br)

    # (N, 1, M) -> (N, M, 1): layout-identical reshape (no data movement).
    sigma = sigma_cm.reshape(N, M, 1)
    return {"rgb": rgb, "sigma": sigma}


class OSGDecoder:
    """JAX/Pallas port of the torch OSGDecoder (tri-plane feature decoder)."""

    def __init__(self, n_features, options, key):
        self.hidden_dim = HIDDEN_DIM
        lr_mul = float(options["decoder_lr_mul"])
        out_total = 1 + int(options["decoder_output_dim"])
        dims = [(n_features, self.hidden_dim),
                (self.hidden_dim, self.hidden_dim),
                (self.hidden_dim, self.hidden_dim),
                (self.hidden_dim, out_total)]
        keys = jax.random.split(key, len(dims))
        self.weights, self.biases = [], []
        for k, (fan_in, fan_out) in zip(keys, dims):
            # torch FullyConnectedLayer: weight ~ randn(out, in) / lr_mul, bias = 0,
            # runtime gains weight_gain = lr_mul / sqrt(in), bias_gain = lr_mul.
            # Gains folded once into the stored ("effective", row-major) params here.
            w_raw = jax.random.normal(k, (fan_out, fan_in), jnp.float32) / lr_mul
            w_eff = jnp.transpose(w_raw) * (lr_mul / np.sqrt(fan_in))   # (in, out)
            b_eff = jnp.zeros((1, fan_out), jnp.float32)                # 0 * lr_mul
            self.weights.append(w_eff)
            self.biases.append(b_eff)

    def __call__(self, sampled_features, point_embedding, sdf):
        # point_embedding and sdf are accepted for signature parity but, exactly as in
        # the reference forward, never read.
        del point_embedding, sdf
        return osg_decoder_forward(sampled_features, self.weights, self.biases)


def _reference_forward(sampled_features, weights, biases):
    """Pure-JAX reference mirroring the torch forward."""
    x = jnp.mean(sampled_features.astype(jnp.float32), axis=1)   # (N, M, C)
    N, M, C = x.shape
    h = x.reshape(N * M, C)
    for i, (w, b) in enumerate(zip(weights, biases)):
        h = jnp.dot(h, w, precision=jax.lax.Precision.HIGHEST) + b
        if i < len(weights) - 1:
            h = jax.nn.softplus(h)
    h = h.reshape(N, M, -1)
    rgb = jax.nn.sigmoid(h[..., 1:]) * (1.0 + 2.0 * 0.001) - 0.001
    sigma = h[..., 0:1]
    return rgb, sigma


if __name__ == "__main__":
    key = jax.random.PRNGKey(0)
    k_feat, k_emb, k_sdf, k_params = jax.random.split(key, 4)

    # Small demo shapes: N=2 scenes, P=3 tri-planes, M=256 sampled points, C=32 features.
    N, P, M, C = 2, 3, 256, 32
    options = {"decoder_lr_mul": 1.0, "decoder_output_dim": 32}

    sampled_features = jax.random.normal(k_feat, (N, P, M, C), jnp.float32)
    point_embedding = jax.random.normal(k_emb, (N, M, C), jnp.float32)   # unused by forward
    sdf = jax.random.normal(k_sdf, (N, M, 1), jnp.float32)               # unused by forward

    model = OSGDecoder(n_features=C, options=options, key=k_params)

    out = model(sampled_features, point_embedding, sdf)
    rgb = jax.block_until_ready(out["rgb"])
    sigma = jax.block_until_ready(out["sigma"])

    ref_rgb, ref_sigma = _reference_forward(sampled_features, model.weights, model.biases)
    # Tolerance covers MXU default matmul precision vs the HIGHEST-precision reference
    # and the EUP tanh-based sigmoid.
    np.testing.assert_allclose(np.asarray(rgb), np.asarray(ref_rgb), rtol=2e-3, atol=2e-3)
    np.testing.assert_allclose(np.asarray(sigma), np.asarray(ref_sigma), rtol=2e-3, atol=2e-3)
    print("KERNEL_OK")
</pallas_src>

<mosaic_0001>
module attributes {stable_mosaic.version = 11 : i64} {
  func.func @_osg_decoder_kernel(%arg0: i32, %arg1: i32, %arg2: memref<1x3x256x32xf32, #tpu.memory_space<vmem>>, %arg3: memref<64x32xf32, #tpu.memory_space<vmem>>, %arg4: memref<64x1xf32, #tpu.memory_space<vmem>>, %arg5: memref<64x64xf32, #tpu.memory_space<vmem>>, %arg6: memref<64x1xf32, #tpu.memory_space<vmem>>, %arg7: memref<64x64xf32, #tpu.memory_space<vmem>>, %arg8: memref<64x1xf32, #tpu.memory_space<vmem>>, %arg9: memref<1x64xf32, #tpu.memory_space<vmem>>, %arg10: memref<1x1xf32, #tpu.memory_space<vmem>>, %arg11: memref<64x32xf32, #tpu.memory_space<vmem>>, %arg12: memref<1x32xf32, #tpu.memory_space<vmem>>, %arg13: memref<1x256x32xf32, #tpu.memory_space<vmem>>, %arg14: memref<1x1x256xf32, #tpu.memory_space<vmem>>) attributes {dimension_semantics = [#tpu.dimension_semantics<parallel>, #tpu.dimension_semantics<parallel>], iteration_bounds = array<i64: 2, 1>, scalar_prefetch = 0 : i64, scratch_operands = 0 : i64, tpu.core_type = #tpu.core_type<tc>, window_params = [{transform_indices = @transform_0, window_bounds = array<i64: 1, 3, 256, 32>}, {pipeline_mode = #tpu.pipeline_mode<synchronous>, transform_indices = @transform_1, window_bounds = array<i64: 64, 32>}, {pipeline_mode = #tpu.pipeline_mode<synchronous>, transform_indices = @transform_2, window_bounds = array<i64: 64, 1>}, {pipeline_mode = #tpu.pipeline_mode<synchronous>, transform_indices = @transform_3, window_bounds = array<i64: 64, 64>}, {pipeline_mode = #tpu.pipeline_mode<synchronous>, transform_indices = @transform_4, window_bounds = array<i64: 64, 1>}, {pipeline_mode = #tpu.pipeline_mode<synchronous>, transform_indices = @transform_5, window_bounds = array<i64: 64, 64>}, {pipeline_mode = #tpu.pipeline_mode<synchronous>, transform_indices = @transform_6, window_bounds = array<i64: 64, 1>}, {pipeline_mode = #tpu.pipeline_mode<synchronous>, transform_indices = @transform_7, window_bounds = array<i64: 1, 64>}, {pipeline_mode = #tpu.pipeline_mode<synchronous>, transform_indices = @transform_8, window_bounds = array<i64: 1, 1>}, {pipeline_mode = #tpu.pipeline_mode<synchronous>, transform_indices = @transform_9, window_bounds = array<i64: 64, 32>}, {pipeline_mode = #tpu.pipeline_mode<synchronous>, transform_indices = @transform_10, window_bounds = array<i64: 1, 32>}, {transform_indices = @transform_11, window_bounds = array<i64: 1, 256, 32>}, {transform_indices = @transform_12, window_bounds = array<i64: 1, 1, 256>}]} {
    %c0 = arith.constant 0 : index
    %c0_0 = arith.constant 0 : index
    %0 = vector.load %arg3[%c0, %c0_0] : memref<64x32xf32, #tpu.memory_space<vmem>>, vector<64x32xf32>
    %c0_1 = arith.constant 0 : index
    %c0_2 = arith.constant 0 : index
    %c0_3 = arith.constant 0 : index
    %c0_4 = arith.constant 0 : index
    %1 = vector.load %arg2[%c0_1, %c0_2, %c0_3, %c0_4] : memref<1x3x256x32xf32, #tpu.memory_space<vmem>>, vector<1x1x256x32xf32>
    %2 = vector.shape_cast %1 : vector<1x1x256x32xf32> to vector<256x32xf32>
    "tpu.trace_start"() <{level = 10 : i32, message = "hc,mc->hm"}> : () -> ()
    %cst = arith.constant dense<0.000000e+00> : vector<64x256xf32>
    %3 = tpu.matmul %0, %2, %cst {dimension_numbers = #tpu.dot_dimension_numbers<[1], [1], [0], [0], [0, 0, 1, 0], [], []>} : vector<64x32xf32>, vector<256x32xf32>, vector<64x256xf32> -> vector<64x256xf32>
    "tpu.trace_stop"() : () -> ()
    %c0_5 = arith.constant 0 : index
    %c1 = arith.constant 1 : index
    %c0_6 = arith.constant 0 : index
    %c0_7 = arith.constant 0 : index
    %4 = vector.load %arg2[%c0_5, %c1, %c0_6, %c0_7] : memref<1x3x256x32xf32, #tpu.memory_space<vmem>>, vector<1x1x256x32xf32>
    %5 = vector.shape_cast %4 : vector<1x1x256x32xf32> to vector<256x32xf32>
    "tpu.trace_start"() <{level = 10 : i32, message = "hc,mc->hm"}> : () -> ()
    %cst_8 = arith.constant dense<0.000000e+00> : vector<64x256xf32>
    %6 = tpu.matmul %0, %5, %cst_8 {dimension_numbers = #tpu.dot_dimension_numbers<[1], [1], [0], [0], [0, 0, 1, 0], [], []>} : vector<64x32xf32>, vector<256x32xf32>, vector<64x256xf32> -> vector<64x256xf32>
    "tpu.trace_stop"() : () -> ()
    %7 = arith.addf %3, %6 : vector<64x256xf32>
    %c0_9 = arith.constant 0 : index
    %c2 = arith.constant 2 : index
    %c0_10 = arith.constant 0 : index
    %c0_11 = arith.constant 0 : index
    %8 = vector.load %arg2[%c0_9, %c2, %c0_10, %c0_11] : memref<1x3x256x32xf32, #tpu.memory_space<vmem>>, vector<1x1x256x32xf32>
    %9 = vector.shape_cast %8 : vector<1x1x256x32xf32> to vector<256x32xf32>
    "tpu.trace_start"() <{level = 10 : i32, message = "hc,mc->hm"}> : () -> ()
    %cst_12 = arith.constant dense<0.000000e+00> : vector<64x256xf32>
    %10 = tpu.matmul %0, %9, %cst_12 {dimension_numbers = #tpu.dot_dimension_numbers<[1], [1], [0], [0], [0, 0, 1, 0], [], []>} : vector<64x32xf32>, vector<256x32xf32>, vector<64x256xf32> -> vector<64x256xf32>
    "tpu.trace_stop"() : () -> ()
    %11 = arith.addf %7, %10 : vector<64x256xf32>
    %c0_13 = arith.constant 0 : index
    %c0_14 = arith.constant 0 : index
    %12 = vector.load %arg4[%c0_13, %c0_14] : memref<64x1xf32, #tpu.memory_space<vmem>>, vector<64x1xf32>
    %13 = vector.broadcast %12 : vector<64x1xf32> to vector<64x256xf32>
    %14 = arith.addf %11, %13 : vector<64x256xf32>
    %cst_15 = arith.constant 0.000000e+00 : f32
    %15 = vector.broadcast %cst_15 : f32 to vector<64x256xf32>
    %16 = arith.maximumf %14, %15 : vector<64x256xf32>
    %17 = math.absf %14 : vector<64x256xf32>
    %cst_16 = arith.constant 0.000000e+00 : f32
    %18 = vector.broadcast %cst_16 : f32 to vector<64x256xf32>
    %19 = arith.subf %18, %17 : vector<64x256xf32>
    %20 = math.exp %19 : vector<64x256xf32>
    %cst_17 = arith.constant 1.000000e+00 : f32
    %21 = vector.broadcast %cst_17 : f32 to vector<64x256xf32>
    %22 = arith.addf %21, %20 : vector<64x256xf32>
    %23 = math.log %22 : vector<64x256xf32>
    %24 = arith.addf %16, %23 : vector<64x256xf32>
    %c0_18 = arith.constant 0 : index
    %c0_19 = arith.constant 0 : index
    %25 = vector.load %arg5[%c0_18, %c0_19] : memref<64x64xf32, #tpu.memory_space<vmem>>, vector<64x64xf32>
    %cst_20 = arith.constant dense<0.000000e+00> : vector<64x256xf32>
    %26 = tpu.matmul %25, %24, %cst_20 {dimension_numbers = #tpu.dot_dimension_numbers<[1], [0], [0], [1], [0, 0, 1, 1], [], []>} : vector<64x64xf32>, vector<64x256xf32>, vector<64x256xf32> -> vector<64x256xf32>
    %c0_21 = arith.constant 0 : index
    %c0_22 = arith.constant 0 : index
    %27 = vector.load %arg6[%c0_21, %c0_22] : memref<64x1xf32, #tpu.memory_space<vmem>>, vector<64x1xf32>
    %28 = vector.broadcast %27 : vector<64x1xf32> to vector<64x256xf32>
    %29 = arith.addf %26, %28 : vector<64x256xf32>
    %cst_23 = arith.constant 0.000000e+00 : f32
    %30 = vector.broadcast %cst_23 : f32 to vector<64x256xf32>
    %31 = arith.maximumf %29, %30 : vector<64x256xf32>
    %32 = math.absf %29 : vector<64x256xf32>
    %cst_24 = arith.constant 0.000000e+00 : f32
    %33 = vector.broadcast %cst_24 : f32 to vector<64x256xf32>
    %34 = arith.subf %33, %32 : vector<64x256xf32>
    %35 = math.exp %34 : vector<64x256xf32>
    %cst_25 = arith.constant 1.000000e+00 : f32
    %36 = vector.broadcast %cst_25 : f32 to vector<64x256xf32>
    %37 = arith.addf %36, %35 : vector<64x256xf32>
    %38 = math.log %37 : vector<64x256xf32>
    %39 = arith.addf %31, %38 : vector<64x256xf32>
    %c0_26 = arith.constant 0 : index
    %c0_27 = arith.constant 0 : index
    %40 = vector.load %arg7[%c0_26, %c0_27] : memref<64x64xf32, #tpu.memory_space<vmem>>, vector<64x64xf32>
    %cst_28 = arith.constant dense<0.000000e+00> : vector<64x256xf32>
    %41 = tpu.matmul %40, %39, %cst_28 {dimension_numbers = #tpu.dot_dimension_numbers<[1], [0], [0], [1], [0, 0, 1, 1], [], []>} : vector<64x64xf32>, vector<64x256xf32>, vector<64x256xf32> -> vector<64x256xf32>
    %c0_29 = arith.constant 0 : index
    %c0_30 = arith.constant 0 : index
    %42 = vector.load %arg8[%c0_29, %c0_30] : memref<64x1xf32, #tpu.memory_space<vmem>>, vector<64x1xf32>
    %43 = vector.broadcast %42 : vector<64x1xf32> to vector<64x256xf32>
    %44 = arith.addf %41, %43 : vector<64x256xf32>
    %cst_31 = arith.constant 0.000000e+00 : f32
    %45 = vector.broadcast %cst_31 : f32 to vector<64x256xf32>
    %46 = arith.maximumf %44, %45 : vector<64x256xf32>
    %47 = math.absf %44 : vector<64x256xf32>
    %cst_32 = arith.constant 0.000000e+00 : f32
    %48 = vector.broadcast %cst_32 : f32 to vector<64x256xf32>
    %49 = arith.subf %48, %47 : vector<64x256xf32>
    %50 = math.exp %49 : vector<64x256xf32>
    %cst_33 = arith.constant 1.000000e+00 : f32
    %51 = vector.broadcast %cst_33 : f32 to vector<64x256xf32>
    %52 = arith.addf %51, %50 : vector<64x256xf32>
    %53 = math.log %52 : vector<64x256xf32>
    %54 = arith.addf %46, %53 : vector<64x256xf32>
    %c0_34 = arith.constant 0 : index
    %c0_35 = arith.constant 0 : index
    %55 = vector.load %arg9[%c0_34, %c0_35] : memref<1x64xf32, #tpu.memory_space<vmem>>, vector<1x64xf32>
    %cst_36 = arith.constant dense<0.000000e+00> : vector<1x256xf32>
    %56 = tpu.matmul %55, %54, %cst_36 {dimension_numbers = #tpu.dot_dimension_numbers<[1], [0], [0], [1], [0, 0, 1, 1], [], []>} : vector<1x64xf32>, vector<64x256xf32>, vector<1x256xf32> -> vector<1x256xf32>
    %c0_37 = arith.constant 0 : index
    %c0_38 = arith.constant 0 : index
    %57 = vector.load %arg10[%c0_37, %c0_38] : memref<1x1xf32, #tpu.memory_space<vmem>>, vector<1x1xf32>
    %58 = vector.broadcast %57 : vector<1x1xf32> to vector<1x256xf32>
    %59 = arith.addf %56, %58 : vector<1x256xf32>
    %c0_39 = arith.constant 0 : index
    %c0_40 = arith.constant 0 : index
    %c0_41 = arith.constant 0 : index
    %60 = vector.load %arg14[%c0_39, %c0_40, %c0_41] : memref<1x1x256xf32, #tpu.memory_space<vmem>>, vector<1x1x256xf32>
    %61 = vector.shape_cast %60 : vector<1x1x256xf32> to vector<1x256xf32>
    %62 = vector.shape_cast %59 : vector<1x256xf32> to vector<1x1x256xf32>
    tpu.vector_store %arg14[%c0_39, %c0_40, %c0_41], %62 {strides = array<i32>} : memref<1x1x256xf32, #tpu.memory_space<vmem>>, vector<1x1x256xf32>,
    %c0_42 = arith.constant 0 : index
    %c0_43 = arith.constant 0 : index
    %63 = vector.load %arg11[%c0_42, %c0_43] : memref<64x32xf32, #tpu.memory_space<vmem>>, vector<64x32xf32>
    "tpu.trace_start"() <{level = 10 : i32, message = "hm,hr->mr"}> : () -> ()
    %cst_44 = arith.constant dense<0.000000e+00> : vector<256x32xf32>
    %64 = tpu.matmul %54, %63, %cst_44 {dimension_numbers = #tpu.dot_dimension_numbers<[0], [0], [1], [1], [0, 1, 1, 1], [], []>} : vector<64x256xf32>, vector<64x32xf32>, vector<256x32xf32> -> vector<256x32xf32>
    "tpu.trace_stop"() : () -> ()
    %c0_45 = arith.constant 0 : index
    %c0_46 = arith.constant 0 : index
    %65 = vector.load %arg12[%c0_45, %c0_46] : memref<1x32xf32, #tpu.memory_space<vmem>>, vector<1x32xf32>
    %66 = vector.broadcast %65 : vector<1x32xf32> to vector<256x32xf32>
    %67 = arith.addf %64, %66 : vector<256x32xf32>
    %cst_47 = arith.constant 5.000000e-01 : f32
    %68 = vector.broadcast %cst_47 : f32 to vector<256x32xf32>
    %69 = arith.mulf %68, %67 : vector<256x32xf32>
    %70 = math.tanh %69 : vector<256x32xf32>
    %cst_48 = arith.constant 5.010000e-01 : f32
    %71 = vector.broadcast %cst_48 : f32 to vector<256x32xf32>
    %72 = arith.mulf %71, %70 : vector<256x32xf32>
    %cst_49 = arith.constant 5.000000e-01 : f32
    %73 = vector.broadcast %cst_49 : f32 to vector<256x32xf32>
    %74 = arith.addf %72, %73 : vector<256x32xf32>
    %c0_50 = arith.constant 0 : index
    %c0_51 = arith.constant 0 : index
    %c0_52 = arith.constant 0 : index
    %75 = vector.load %arg13[%c0_50, %c0_51, %c0_52] : memref<1x256x32xf32, #tpu.memory_space<vmem>>, vector<1x256x32xf32>
    %76 = vector.shape_cast %75 : vector<1x256x32xf32> to vector<256x32xf32>
    %77 = vector.shape_cast %74 : vector<256x32xf32> to vector<1x256x32xf32>
    tpu.vector_store %arg13[%c0_50, %c0_51, %c0_52], %77 {strides = array<i32>} : memref<1x256x32xf32, #tpu.memory_space<vmem>>, vector<1x256x32xf32>,
    return
  }
  func.func @transform_0(%arg0: i32, %arg1: i32) -> (i32, i32, i32, i32) {
    %c0_i32 = arith.constant 0 : i32
    %c0_i32_0 = arith.constant 0 : i32
    %c0_i32_1 = arith.constant 0 : i32
    return %arg0, %c0_i32, %arg1, %c0_i32_0 : i32, i32, i32, i32
  }
  func.func @transform_1(%arg0: i32, %arg1: i32) -> (i32, i32) {
    %c0_i32 = arith.constant 0 : i32
    %c0_i32_0 = arith.constant 0 : i32
    %c0_i32_1 = arith.constant 0 : i32
    return %c0_i32, %c0_i32_0 : i32, i32
  }
  func.func @transform_2(%arg0: i32, %arg1: i32) -> (i32, i32) {
    %c0_i32 = arith.constant 0 : i32
    %c0_i32_0 = arith.constant 0 : i32
    %c0_i32_1 = arith.constant 0 : i32
    return %c0_i32, %c0_i32_0 : i32, i32
  }
  func.func @transform_3(%arg0: i32, %arg1: i32) -> (i32, i32) {
    %c0_i32 = arith.constant 0 : i32
    %c0_i32_0 = arith.constant 0 : i32
    %c0_i32_1 = arith.constant 0 : i32
    return %c0_i32, %c0_i32_0 : i32, i32
  }
  func.func @transform_4(%arg0: i32, %arg1: i32) -> (i32, i32) {
    %c0_i32 = arith.constant 0 : i32
    %c0_i32_0 = arith.constant 0 : i32
    %c0_i32_1 = arith.constant 0 : i32
    return %c0_i32, %c0_i32_0 : i32, i32
  }
  func.func @transform_5(%arg0: i32, %arg1: i32) -> (i32, i32) {
    %c0_i32 = arith.constant 0 : i32
    %c0_i32_0 = arith.constant 0 : i32
    %c0_i32_1 = arith.constant 0 : i32
    return %c0_i32, %c0_i32_0 : i32, i32
  }
  func.func @transform_6(%arg0: i32, %arg1: i32) -> (i32, i32) {
    %c0_i32 = arith.constant 0 : i32
    %c0_i32_0 = arith.constant 0 : i32
    %c0_i32_1 = arith.constant 0 : i32
    return %c0_i32, %c0_i32_0 : i32, i32
  }
  func.func @transform_7(%arg0: i32, %arg1: i32) -> (i32, i32) {
    %c0_i32 = arith.constant 0 : i32
    %c0_i32_0 = arith.constant 0 : i32
    %c0_i32_1 = arith.constant 0 : i32
    return %c0_i32, %c0_i32_0 : i32, i32
  }
  func.func @transform_8(%arg0: i32, %arg1: i32) -> (i32, i32) {
    %c0_i32 = arith.constant 0 : i32
    %c0_i32_0 = arith.constant 0 : i32
    %c0_i32_1 = arith.constant 0 : i32
    return %c0_i32, %c0_i32_0 : i32, i32
  }
  func.func @transform_9(%arg0: i32, %arg1: i32) -> (i32, i32) {
    %c0_i32 = arith.constant 0 : i32
    %c0_i32_0 = arith.constant 0 : i32
    %c0_i32_1 = arith.constant 0 : i32
    return %c0_i32, %c0_i32_0 : i32, i32
  }
  func.func @transform_10(%arg0: i32, %arg1: i32) -> (i32, i32) {
    %c0_i32 = arith.constant 0 : i32
    %c0_i32_0 = arith.constant 0 : i32
    %c0_i32_1 = arith.constant 0 : i32
    return %c0_i32, %c0_i32_0 : i32, i32
  }
  func.func @transform_11(%arg0: i32, %arg1: i32) -> (i32, i32, i32) {
    %c0_i32 = arith.constant 0 : i32
    %c0_i32_0 = arith.constant 0 : i32
    return %arg0, %arg1, %c0_i32 : i32, i32, i32
  }
  func.func @transform_12(%arg0: i32, %arg1: i32) -> (i32, i32, i32) {
    %c0_i32 = arith.constant 0 : i32
    %c0_i32_0 = arith.constant 0 : i32
    return %arg0, %c0_i32, %arg1 : i32, i32, i32
  }
}

</mosaic_0001>

<bundles_post_ra>
// kernel: tpu_custom_call.1
= control target key start
LH: loop header
LB: loop body
LE: loop exit
PB: predicated region body
PF: predicated region fallthrough
CT: control target
= control target key end

     0   :  { %s4475_s0 = inlined_call_operand.vmem [shape: f32[2,3,256,32], index: 0, kind: input, shape index: {}]   ;;  %s4476_s1 = inlined_call_operand.vmem [shape: f32[64,32], index: 1, kind: input, shape index: {}]   ;;  %s4477_s2 = inlined_call_operand.vmem [shape: f32[64,1], index: 2, kind: input, shape index: {}]   ;;  %s4478_s3 = inlined_call_operand.vmem [shape: f32[64,64], index: 3, kind: input, shape index: {}]   ;;  %s4479_s4 = inlined_call_operand.vmem [shape: f32[64,1], index: 4, kind: input, shape index: {}]   ;;  %s4480_s5 = inlined_call_operand.vmem [shape: f32[64,64], index: 5, kind: input, shape index: {}]   ;;  %s4481_s6 = inlined_call_operand.vmem [shape: f32[64,1], index: 6, kind: input, shape index: {}]   ;;  %s4482_s7 = inlined_call_operand.vmem [shape: f32[1,64], index: 7, kind: input, shape index: {}]   ;;  %s4483_s8 = inlined_call_operand.<no memory space> [shape: f32[1,1], index: 8, kind: input, shape index: {}]   ;;  %s4484_s9 = inlined_call_operand.vmem [shape: f32[64,32], index: 9, kind: input, shape index: {}]   ;;  %s4485_s10 = inlined_call_operand.vmem [shape: f32[1,32], index: 10, kind: input, shape index: {}]   ;;  %s4486_s11 = inlined_call_operand.vmem [shape: f32[2,256,32], index: 11, kind: output, shape index: {0}]   ;;  %s4487_s12 = inlined_call_operand.hbm [shape: f32[2,1,256], index: 12, kind: output, shape index: {1}]  }
   0x1   :  { %4489 = sst [smem:[#allocation6_spill]] %s4475_s0  ;;  %v18_v0 = vstv %s4483_s8 }
   0x2   :  { %4490 = sst [smem:[#allocation7_spill]] %s4476_s1  ;;  %19 = vst [vmem:[#allocation2] sm:$0x1] %v18_v0 }
   0x3   :  { %4491 = sst [smem:[#allocation8_spill]] %s4477_s2 }
   0x4   :  { %20 = vsyncpa [#allocation4], 0 }
   0x5   :  { %22 = vsyncpa [#allocation4 + $0x1], 0  ;;  %s3392_s23 = smov 0   ;;  %s3394_s24 = smov 0  }
   0x6   :  { %s3396_s25 = smov 0   ;;  %s3398_s26 = smov 0  }
   0x7   :  { %s3400_s27 = smov 0   ;;  %s3402_s28 = smov 0  }
   0x8 LB: > { %s2621_s8 = sadd.s32 4294967295, %s3321_s28   ;;  %s2622_s29 = sadd.s32 4294967294, %s3321_s28   ;;  %s3321_s28 = sphi %s3402_s28, %s28_s28   ;;  %s3317_s27 = sphi %s3400_s27, %s4502_s27   ;;  %s3313_s26 = sphi %s3398_s26, %s4501_s26   ;;  %s3309_s25 = sphi %s3396_s25, %s4500_s25   ;;  %s3305_s24 = sphi %s3394_s24, %s4499_s24   ;;  %s3301_s23 = sphi %s3392_s23, %s4498_s23  }
   0x9   : > { %s40_s30 = sadd.s32 1, %s3317_s27  ;;  %s315_s13 = sadd.s32 1, %s3309_s25 }
   0xa   : > { %p42_p0 = scmp.ge.s32.totalorder %s40_s30, 2  ;;  %p325_p1 = scmp.ne.s32.totalorder %s3309_s25, %s3305_s24 }
   0xb   : > { %p326_p2 = scmp.eq.s32.totalorder %s2621_s8, 1  ;;  %p331_p3 = scmp.ne.s32.totalorder %s3305_s24, %s3301_s23 }
   0xc   : > { %s4504_s30 = smov (%p42_p0, %s40_s30), 0  ;;  %p332_p5 = scmp.eq.s32.totalorder %s2622_s29, 1 }
   0xd   : > { %p3432_p4 = por %p326_p2, %p325_p1  ;;  %s310_s15 = ssub.s32 %s3317_s27, %s4504_s30 }
   0xe   : > { %p2625_p6 = scmp.ge.s32.totalorder %s3321_s28, 1  ;;  %p313_p7 = scmp.eq.s32.totalorder %s310_s15, 0 }
   0xf   : > { %p3439_p8 = por %p332_p5, %p331_p3  ;;  %p393_p9 = scmp.lt.s32.totalorder %s3321_s28, 3 }
  0x10   : > { %s3445_s17 = scalar_select %p313_p7, %s3309_s25, %s315_s13  }
  0x11   : > { %p394_p10 = pnand %p2625_p6, %p393_p9 }
  0x12   : > { %p449_p11 = scmp.lt.s32.totalorder (!%p394_p10), %s3313_s26, 1  ;;  %s4494_s0 = sld [smem:[#allocation6_spill]] (!%p394_p10) }
  0x13   : > { %397 = sbr.rel (%p394_p10) target bundleno = 1290 (0x50a), region = 64  ;;  %s4495_s1 = sld [smem:[#allocation7_spill]] (!%p394_p10) }
  0x14   : > { %s4496_s2 = sld [smem:[#allocation8_spill]] (!%p394_p10)  ;;  %s4488_s20 = sand.u32 (!%p394_p10), 1, %s3305_s24  }
  0x15   : > { %s4303_s21 = sshll.u32 (!%p394_p10), %s4488_s20, 1 }
  0x16   : > { %s447_s8 = scalar_lea.vmem (!%p394_p10), [#allocation3], %s4303_s21  ;;  %s3263_s21 = scalar_lea.hbm (!%p394_p10), %s4487_s12, 4 }
  0x18   : > { %s3449_s18 = scalar_select %p449_p11, %s3313_s26, 1  ;;  %vm542_vm0 = vcmask 261120   ;;  %vm1414_vm1 = vcmask 523264   ;;  %vm2025_vm2 = vcmask 1040384  }
  0x19   : > { %v3557_v51 = vld [vmem:[%s4495_s1] sm:$0xff]  ;;  %v3580_v58 = vld [vmem:[%s4495_s1 + $0x8] sm:$0xff] }
  0x1a   : > { %s2925_s19 = smul.u32 768, %s3449_s18  ;;  %s2908_s15 = sshll.u32 %s3449_s18, 8 }
  0x1b   : > { %s4325_s29 = scalar_lea.vmem %s4486_s11, %s2908_s15  ;;  %s2905_s18 = sshll.u32 %s3313_s26, 1 }
  0x1c   : > { %s3455_s22 = scalar_lea.vmem %s4494_s0, %s2925_s19  ;;  %s2506_s19 = sshll.u32 %s447_s8, 4  ;;  %s2507_s19 = int_to_ptr.vmem [resolvable:$true] %s2506_s19 }
  0x1d   : > { %v2645_v1 = vld [vmem:[%s3455_s22 + $0x178] sm:$0xff]  ;;  %v2644_v4 = vld [vmem:[%s3455_s22 + $0x170] sm:$0xff]  ;;  %v2643_v7 = vld [vmem:[%s3455_s22 + $0x168] sm:$0xff]  ;;  %s4497_s0 = sand.u32 1, %s3305_s24  }
  0x1e   : > { %v492_v2 = vld [vmem:[%s3455_s22 + $0x78] sm:$0xff]  ;;  %2662 = vmatpush.xpose.msk.msra.mxu0 %vm542_vm0, %v2645_v1  ;;  %v491_v5 = vld [vmem:[%s3455_s22 + $0x70] sm:$0xff]  ;;  %v490_v8 = vld [vmem:[%s3455_s22 + $0x68] sm:$0xff] }
  0x1f   : > { %2710 = vmatpush.xpose.msk.msra.mxu3 %vm542_vm0, %v492_v2  ;;  %v2661_v3 = vld [vmem:[%s3455_s22 + $0x1f8] sm:$0xff]  ;;  %v2660_v6 = vld [vmem:[%s3455_s22 + $0x1f0] sm:$0xff]  ;;  %v2659_v9 = vld [vmem:[%s3455_s22 + $0x1e8] sm:$0xff] }
  0x20   : > { %2686 = vmatpush.xpose.msk.msra.mxu1 %vm542_vm0, %v2661_v3  ;;  %v2642_v10 = vld [vmem:[%s3455_s22 + $0x160] sm:$0xff]  ;;  %v2641_v13 = vld [vmem:[%s3455_s22 + $0x158] sm:$0xff]  ;;  %v2640_v16 = vld [vmem:[%s3455_s22 + $0x150] sm:$0xff] }
  0x21   : > { %v489_v11 = vld [vmem:[%s3455_s22 + $0x60] sm:$0xff]  ;;  %v488_v14 = vld [vmem:[%s3455_s22 + $0x58] sm:$0xff]  ;;  %v487_v17 = vld [vmem:[%s3455_s22 + $0x50] sm:$0xff] }
  0x22   : > { %2663 = vmatpush.xpose.msk.msra.mxu0 %vm542_vm0, %v2644_v4  ;;  %v2658_v12 = vld [vmem:[%s3455_s22 + $0x1e0] sm:$0xff]  ;;  %v2657_v15 = vld [vmem:[%s3455_s22 + $0x1d8] sm:$0xff]  ;;  %v2656_v18 = vld [vmem:[%s3455_s22 + $0x1d0] sm:$0xff] }
  0x23   : > { %2711 = vmatpush.xpose.msk.msra.mxu3 %vm542_vm0, %v491_v5  ;;  %v2639_v19 = vld [vmem:[%s3455_s22 + $0x148] sm:$0xff]  ;;  %v2638_v22 = vld [vmem:[%s3455_s22 + $0x140] sm:$0xff]  ;;  %v2637_v25 = vld [vmem:[%s3455_s22 + $0x138] sm:$0xff] }
  0x24   : > { %2687 = vmatpush.xpose.msk.msra.mxu1 %vm542_vm0, %v2660_v6  ;;  %v486_v20 = vld [vmem:[%s3455_s22 + $0x48] sm:$0xff]  ;;  %v485_v23 = vld [vmem:[%s3455_s22 + $0x40] sm:$0xff]  ;;  %v484_v26 = vld [vmem:[%s3455_s22 + $0x38] sm:$0xff] }
  0x25   : > { %v2655_v21 = vld [vmem:[%s3455_s22 + $0x1c8] sm:$0xff]  ;;  %v2654_v24 = vld [vmem:[%s3455_s22 + $0x1c0] sm:$0xff]  ;;  %v2653_v27 = vld [vmem:[%s3455_s22 + $0x1b8] sm:$0xff] }
  0x26   : > { %2664 = vmatpush.xpose.msk.msra.mxu0 %vm542_vm0, %v2643_v7  ;;  %v2636_v28 = vld [vmem:[%s3455_s22 + $0x130] sm:$0xff]  ;;  %v2635_v31 = vld [vmem:[%s3455_s22 + $0x128] sm:$0xff]  ;;  %v2634_v34 = vld [vmem:[%s3455_s22 + $0x120] sm:$0xff] }
  0x27   : > { %2712 = vmatpush.xpose.msk.msra.mxu3 %vm542_vm0, %v490_v8  ;;  %v483_v29 = vld [vmem:[%s3455_s22 + $0x30] sm:$0xff]  ;;  %v482_v32 = vld [vmem:[%s3455_s22 + $0x28] sm:$0xff]  ;;  %v481_v35 = vld [vmem:[%s3455_s22 + $0x20] sm:$0xff] }
  0x28   : > { %2688 = vmatpush.xpose.msk.msra.mxu1 %vm542_vm0, %v2659_v9  ;;  %v2652_v30 = vld [vmem:[%s3455_s22 + $0x1b0] sm:$0xff]  ;;  %v2651_v33 = vld [vmem:[%s3455_s22 + $0x1a8] sm:$0xff]  ;;  %v2650_v36 = vld [vmem:[%s3455_s22 + $0x1a0] sm:$0xff] }
  0x29   : > { %v2633_v37 = vld [vmem:[%s3455_s22 + $0x118] sm:$0xff]  ;;  %v2632_v40 = vld [vmem:[%s3455_s22 + $0x110] sm:$0xff]  ;;  %v2631_v43 = vld [vmem:[%s3455_s22 + $0x108] sm:$0xff] }
  0x2a   : > { %2665 = vmatpush.xpose.msk.msra.mxu0 %vm542_vm0, %v2642_v10  ;;  %v480_v38 = vld [vmem:[%s3455_s22 + $0x18] sm:$0xff]  ;;  %v479_v41 = vld [vmem:[%s3455_s22 + $0x10] sm:$0xff]  ;;  %v478_v44 = vld [vmem:[%s3455_s22 + $0x8] sm:$0xff] }
  0x2b   : > { %2713 = vmatpush.xpose.msk.msra.mxu3 %vm542_vm0, %v489_v11  ;;  %v2649_v39 = vld [vmem:[%s3455_s22 + $0x198] sm:$0xff]  ;;  %v2648_v42 = vld [vmem:[%s3455_s22 + $0x190] sm:$0xff]  ;;  %v2647_v45 = vld [vmem:[%s3455_s22 + $0x188] sm:$0xff] }
  0x2c   : > { %2689 = vmatpush.xpose.msk.msra.mxu1 %vm542_vm0, %v2658_v12  ;;  %v2630_v46 = vld [vmem:[%s3455_s22 + $0x100] sm:$0xff]  ;;  %v508_v48 = vld [vmem:[%s3455_s22 + $0xf8] sm:$0xff]  ;;  %v507_v53 = vld [vmem:[%s3455_s22 + $0xf0] sm:$0xff]  ;;  %v3323_v12 = vmov 0  }
  0x2d   : > { %v477_v47 = vld [vmem:[%s3455_s22] sm:$0xff]  ;;  %v2773_v49 = vld [vmem:[%s3455_s22 + $0x278] sm:$0xff]  ;;  %v2772_v54 = vld [vmem:[%s3455_s22 + $0x270] sm:$0xff]  ;;  %2984 = vset.pattern.permute.xlu1 %v3323_v12  ;;  %2983 = vset.pattern.permute.xlu0 %v3323_v12 }
  0x2e   : > { %2666 = vmatpush.xpose.msk.msra.mxu0 %vm542_vm0, %v2641_v13  ;;  %v2646_v50 = vld [vmem:[%s3455_s22 + $0x180] sm:$0xff]  ;;  %v2789_v52 = vld [vmem:[%s3455_s22 + $0x2f8] sm:$0xff]  ;;  %v2788_v55 = vld [vmem:[%s3455_s22 + $0x2f0] sm:$0xff]  ;;  %2985 = vset.pattern.permute.xlu2 %v3323_v12 }
  0x2f   : > { %2714 = vmatpush.xpose.msk.msra.mxu3 %vm542_vm0, %v488_v14  ;;  %v506_v56 = vld [vmem:[%s3455_s22 + $0xe8] sm:$0xff]  ;;  %v505_v60 = vld [vmem:[%s3455_s22 + $0xe0] sm:$0xff]  ;;  %v504_v63 = vld [vmem:[%s3455_s22 + $0xd8] sm:$0xff] }
  0x30   : > { %2690 = vmatpush.xpose.msk.msra.mxu1 %vm542_vm0, %v2657_v15  ;;  %v2771_v57 = vld [vmem:[%s3455_s22 + $0x268] sm:$0xff]  ;;  %v2770_v61 = vld [vmem:[%s3455_s22 + $0x260] sm:$0xff]  ;;  %v2769_v0 = vld [vmem:[%s3455_s22 + $0x258] sm:$0xff] }
  0x31   : > { %v2787_v59 = vld [vmem:[%s3455_s22 + $0x2e8] sm:$0xff]  ;;  %v2786_v62 = vld [vmem:[%s3455_s22 + $0x2e0] sm:$0xff]  ;;  %v3603_v1 = vld [vmem:[%s4495_s1 + $0x10] sm:$0xff] }
  0x32   : > { %2667 = vmatpush.xpose.msk.msra.mxu0 %vm542_vm0, %v2640_v16  ;;  %v2785_v2 = vld [vmem:[%s3455_s22 + $0x2d8] sm:$0xff]  ;;  %v503_v3 = vld [vmem:[%s3455_s22 + $0xd0] sm:$0xff]  ;;  %v502_v6 = vld [vmem:[%s3455_s22 + $0xc8] sm:$0xff] }
  0x33   : > { %2715 = vmatpush.xpose.msk.msra.mxu3 %vm542_vm0, %v487_v17  ;;  %v2768_v4 = vld [vmem:[%s3455_s22 + $0x250] sm:$0xff]  ;;  %v2767_v7 = vld [vmem:[%s3455_s22 + $0x248] sm:$0xff]  ;;  %v3626_v8 = vld [vmem:[%s4495_s1 + $0x18] sm:$0xff] }
  0x34   : > { %2691 = vmatpush.xpose.msk.msra.mxu1 %vm542_vm0, %v2656_v18  ;;  %v2784_v5 = vld [vmem:[%s3455_s22 + $0x2d0] sm:$0xff]  ;;  %v2783_v9 = vld [vmem:[%s3455_s22 + $0x2c8] sm:$0xff]  ;;  %v501_v10 = vld [vmem:[%s3455_s22 + $0xc0] sm:$0xff] }
  0x35   : > { %v2766_v11 = vld [vmem:[%s3455_s22 + $0x240] sm:$0xff]  ;;  %v1155_v13 = vld [vmem:[%s4496_s2 + $0x28] sm:$0xff]  ;;  %v500_v15 = vld [vmem:[%s3455_s22 + $0xb8] sm:$0xff] }
  0x36   : > { %2668 = vmatpush.xpose.msk.msra.mxu0 %vm542_vm0, %v2639_v19  ;;  %v2782_v14 = vld [vmem:[%s3455_s22 + $0x2c0] sm:$0xff]  ;;  %v2765_v16 = vld [vmem:[%s3455_s22 + $0x238] sm:$0xff]  ;;  %1185 = vperm.xlu1 %2984, %v1155_v13   ;;  %v499_v19 = vld [vmem:[%s3455_s22 + $0xb0] sm:$0xff] }
  0x37   : > { %2716 = vmatpush.xpose.msk.msra.mxu3 %vm542_vm0, %v486_v20  ;;  %v3652_v17 = vld [vmem:[%s4495_s1 + $0x20] sm:$0xff]  ;;  %v2781_v18 = vld [vmem:[%s3455_s22 + $0x2b8] sm:$0xff]  ;;  %v2764_v20 = vld [vmem:[%s3455_s22 + $0x230] sm:$0xff] }
  0x38   : > { %2692 = vmatpush.xpose.msk.msra.mxu1 %vm542_vm0, %v2655_v21  ;;  %v1157_v21 = vld [vmem:[%s4496_s2 + $0x38] sm:$0xff] }
  0x39   : > { %1195 = vperm.xlu0 %2983, %v1157_v21  }
  0x3a   : > { %2669 = vmatpush.xpose.msk.msra.mxu0 %vm542_vm0, %v2638_v22  ;;  %v1154_v22 = vld [vmem:[%s4496_s2 + $0x20] sm:$0xff] }
  0x3b   : > { %2717 = vmatpush.xpose.msk.msra.mxu3 %vm542_vm0, %v485_v23  ;;  %v2780_v23 = vld [vmem:[%s3455_s22 + $0x2b0] sm:$0xff] }
  0x3c   : > { %2693 = vmatpush.xpose.msk.msra.mxu1 %vm542_vm0, %v2654_v24  ;;  %v498_v24 = vld [vmem:[%s3455_s22 + $0xa8] sm:$0xff] }
  0x3e   : > { %2670 = vmatpush.xpose.msk.msra.mxu0 %vm542_vm0, %v2637_v25  ;;  %v2763_v25 = vld [vmem:[%s3455_s22 + $0x228] sm:$0xff]  ;;  %1180 = vperm.xlu1 %2984, %v1154_v22  }
  0x3f   : > { %2718 = vmatpush.xpose.msk.msra.mxu3 %vm542_vm0, %v484_v26  ;;  %v3681_v26 = vld [vmem:[%s4495_s1 + $0x28] sm:$0xff] }
  0x40   : > { %2694 = vmatpush.xpose.msk.msra.mxu1 %vm542_vm0, %v2653_v27  ;;  %v2779_v27 = vld [vmem:[%s3455_s22 + $0x2a8] sm:$0xff] }
  0x42   : > { %2671 = vmatpush.xpose.msk.msra.mxu0 %vm542_vm0, %v2636_v28  ;;  %v497_v28 = vld [vmem:[%s3455_s22 + $0xa0] sm:$0xff] }
  0x43   : > { %2719 = vmatpush.xpose.msk.msra.mxu3 %vm542_vm0, %v483_v29  ;;  %v2762_v29 = vld [vmem:[%s3455_s22 + $0x220] sm:$0xff] }
  0x44   : > { %2695 = vmatpush.xpose.msk.msra.mxu1 %vm542_vm0, %v2652_v30  ;;  %v1156_v30 = vld [vmem:[%s4496_s2 + $0x30] sm:$0xff] }
  0x45   : > { %1190 = vperm.xlu0 %2983, %v1156_v30  }
  0x46   : > { %2672 = vmatpush.xpose.msk.msra.mxu0 %vm542_vm0, %v2635_v31  ;;  %v1150_v31 = vld [vmem:[%s4496_s2] sm:$0xff] }
  0x47   : > { %2720 = vmatpush.xpose.msk.msra.mxu3 %vm542_vm0, %v482_v32  ;;  %v2778_v32 = vld [vmem:[%s3455_s22 + $0x2a0] sm:$0xff]  ;;  %1160 = vperm.xlu1 %2984, %v1150_v31  }
  0x48   : > { %2696 = vmatpush.xpose.msk.msra.mxu1 %vm542_vm0, %v2651_v33  ;;  %v496_v33 = vld [vmem:[%s3455_s22 + $0x98] sm:$0xff] }
  0x4a   : > { %2673 = vmatpush.xpose.msk.msra.mxu0 %vm542_vm0, %v2634_v34  ;;  %v2761_v34 = vld [vmem:[%s3455_s22 + $0x218] sm:$0xff] }
  0x4b   : > { %2721 = vmatpush.xpose.msk.msra.mxu3 %vm542_vm0, %v481_v35  ;;  %v3710_v35 = vld [vmem:[%s4495_s1 + $0x30] sm:$0xff] }
  0x4c   : > { %2697 = vmatpush.xpose.msk.msra.mxu1 %vm542_vm0, %v2650_v36  ;;  %v2777_v36 = vld [vmem:[%s3455_s22 + $0x298] sm:$0xff] }
  0x4e   : > { %2674 = vmatpush.xpose.msk.msra.mxu0 %vm542_vm0, %v2633_v37  ;;  %v495_v37 = vld [vmem:[%s3455_s22 + $0x90] sm:$0xff] }
  0x4f   : > { %2722 = vmatpush.xpose.msk.msra.mxu3 %vm542_vm0, %v480_v38  ;;  %v2760_v38 = vld [vmem:[%s3455_s22 + $0x210] sm:$0xff] }
  0x50   : > { %2698 = vmatpush.xpose.msk.msra.mxu1 %vm542_vm0, %v2649_v39  ;;  %v1151_v39 = vld [vmem:[%s4496_s2 + $0x8] sm:$0xff] }
  0x51   : > { %1165 = vperm.xlu0 %2983, %v1151_v39  }
  0x52   : > { %2675 = vmatpush.xpose.msk.msra.mxu0 %vm542_vm0, %v2632_v40  ;;  %v2776_v40 = vld [vmem:[%s3455_s22 + $0x290] sm:$0xff] }
  0x53   : > { %2723 = vmatpush.xpose.msk.msra.mxu3 %vm542_vm0, %v479_v41  ;;  %v494_v41 = vld [vmem:[%s3455_s22 + $0x88] sm:$0xff] }
  0x54   : > { %2699 = vmatpush.xpose.msk.msra.mxu1 %vm542_vm0, %v2648_v42  ;;  %v2759_v42 = vld [vmem:[%s3455_s22 + $0x208] sm:$0xff] }
  0x56   : > { %2676 = vmatpush.xpose.msk.msra.mxu0 %vm542_vm0, %v2631_v43  ;;  %v3736_v43 = vld [vmem:[%s4495_s1 + $0x38] sm:$0xff]  ;;  %s2488_s1 = scalar_lea.sflag [#allocation4], %s4497_s0 }
  0x57   : > { %2724 = vmatpush.xpose.msk.msra.mxu3 %vm542_vm0, %v478_v44  ;;  %v2775_v44 = vld [vmem:[%s3455_s22 + $0x288] sm:$0xff] }
  0x58   : > { %2700 = vmatpush.xpose.msk.msra.mxu1 %vm542_vm0, %v2647_v45  ;;  %v493_v45 = vld [vmem:[%s3455_s22 + $0x80] sm:$0xff] }
  0x5a   : > { %2677 = vmatpush.xpose.msk.msra.mxu0 %vm542_vm0, %v2630_v46  ;;  %v2758_v46 = vld [vmem:[%s3455_s22 + $0x200] sm:$0xff] }
  0x5b   : > { %2725 = vmatpush.xpose.msk.msra.mxu3 %vm542_vm0, %v477_v47  ;;  %v2774_v47 = vld [vmem:[%s3455_s22 + $0x280] sm:$0xff]  ;;  %s2504_s22 = scalar_lea.hbm %s4487_s12, %s2905_s18 }
  0x5c   : > { %2701 = vmatpush.xpose.msk.msra.mxu1 %vm542_vm0, %v2646_v50  ;;  %v1371_v50 = vld [vmem:[%s4479_s4 + $0x28] sm:$0xff]  ;;  %s2508_s20 = sshll.u32 %s2504_s22, 4  ;;  %s2509_s20 = int_to_ptr.hbm [resolvable:$true] %s2508_s20 }
  0x5d   : > { %2678 = vmatmul.msk.f32.vlgmr.msra.gmra.mxu0 %vm542_vm0, %v3557_v51  ;;  %1401 = vperm.xlu1 %2984, %v1371_v50   ;;  %s3257_s26 = sshra.s32 %s2509_s20, 4  ;;  %s3258_s26 = int_to_ptr.hbm [resolvable:$true] %s3257_s26 }
  0x5e   : > { %2790 = vmatpush.xpose.msk.msrb.mxu0 %vm542_vm0, %v2773_v49  ;;  %2726 = vmatmul.msk.f32.vlgmr.msra.gmra.mxu3 %vm542_vm0, %v3557_v51  ;;  %v1153_v49 = vld [vmem:[%s4496_s2 + $0x18] sm:$0xff]  ;;  %p3264_p1 = scmp.lt.s32.totalorder %s3258_s26, %s4487_s12 }
  0x5f   : > { %2734 = vmatpush.xpose.msk.msrb.mxu3 %vm542_vm0, %v508_v48  ;;  %2702 = vmatmul.msk.f32.vlgmr.msra.gmra.mxu1 %vm542_vm0, %v3557_v51  ;;  %v1372_v48 = vld [vmem:[%s4479_s4 + $0x30] sm:$0xff] }
  0x60   : > { %2814 = vmatpush.xpose.msk.msrb.mxu1 %vm542_vm0, %v2789_v52  ;;  %1406 = vperm.xlu0 %2983, %v1372_v48   ;;  %v1369_v52 = vld [vmem:[%s4479_s4 + $0x18] sm:$0xff] }
  0x61   : > { %1175 = vperm.xlu2 %2985, %v1153_v49  }
  0x62   : > { %2791 = vmatpush.xpose.msk.msrb.mxu0 %vm542_vm0, %v2772_v54  ;;  %v1366_v54 = vld [vmem:[%s4479_s4] sm:$0xff] }
  0x63   : > { %2735 = vmatpush.xpose.msk.msrb.mxu3 %vm542_vm0, %v507_v53  ;;  %v1152_v53 = vld [vmem:[%s4496_s2 + $0x10] sm:$0xff]  ;;  %s3259_s2 = scalar_lea.hbm %s3258_s26, 2 }
  0x64   : > { %2815 = vmatpush.xpose.msk.msrb.mxu1 %vm542_vm0, %v2788_v55  ;;  %v1373_v55 = vld [vmem:[%s4479_s4 + $0x38] sm:$0xff]  ;;  %p3260_p12 = scmp.ne.s32.totalorder %s3258_s26, %s3259_s2  ;;  %p3265_p2 = scmp.lt.s32.totalorder %s3263_s21, %s3259_s2 }
  0x65   : > { %2679 = vmatmul.msk.f32.gmra.mxu0 %vm542_vm0, %v3580_v58 }
  0x66   : > { %2792 = vmatpush.xpose.msk.msrb.mxu0 %vm542_vm0, %v2771_v57  ;;  %2727 = vmatmul.msk.f32.gmra.mxu3 %vm542_vm0, %v3580_v58  ;;  %v1675_v57 = vld [vmem:[%s4481_s6 + $0x10] sm:$0xff]  ;;  %p3261_p13 = pnand %p3260_p12, %p3432_p4  ;;  %p3266_p3 = por %p3265_p2, %p3264_p1 }
  0x67   : > { %2736 = vmatpush.xpose.msk.msrb.mxu3 %vm542_vm0, %v506_v56  ;;  %2703 = vmatmul.msk.f32.gmra.mxu1 %vm542_vm0, %v3580_v58  ;;  %v1673_v56 = vld [vmem:[%s4481_s6] sm:$0xff] }
  0x68   : > { %2816 = vmatpush.xpose.msk.msrb.mxu1 %vm542_vm0, %v2787_v59  ;;  %1391 = vperm.xlu0 %2983, %v1369_v52   ;;  %v1676_v59 = vld [vmem:[%s4481_s6 + $0x18] sm:$0xff]  ;;  %p3262_p0 = pneg %p3261_p13 }
  0x69   : > { %1170 = vperm.xlu2 %2985, %v1152_v53  }
  0x6a   : > { %2793 = vmatpush.xpose.msk.msrb.mxu0 %vm542_vm0, %v2770_v61  ;;  %v1367_v61 = vld [vmem:[%s4479_s4 + $0x8] sm:$0xff]  ;;  %p3267_p5 = pnand %p3266_p3, %p3262_p0 }
  0x6b   : > { %2737 = vmatpush.xpose.msk.msrb.mxu3 %vm542_vm0, %v505_v60  ;;  %v1680_v60 = vld [vmem:[%s4481_s6 + $0x38] sm:$0xff] }
  0x6c   : > { %2817 = vmatpush.xpose.msk.msrb.mxu1 %vm542_vm0, %v2786_v62  ;;  %v1678_v62 = vld [vmem:[%s4481_s6 + $0x28] sm:$0xff] }
  0x6d   : > { %2680 = vmatmul.msk.f32.gmra.mxu0 %vm542_vm0, %v3603_v1 }
  0x6e   : > { %2794 = vmatpush.xpose.msk.msrb.mxu0 %vm542_vm0, %v2769_v0  ;;  %2728 = vmatmul.msk.f32.gmra.mxu3 %vm542_vm0, %v3603_v1  ;;  %v1677_v0 = vld [vmem:[%s4481_s6 + $0x20] sm:$0xff] }
  0x6f   : > { %2738 = vmatpush.xpose.msk.msrb.mxu3 %vm542_vm0, %v504_v63  ;;  %2704 = vmatmul.msk.f32.gmra.mxu1 %vm542_vm0, %v3603_v1  ;;  %v1674_v63 = vld [vmem:[%s4481_s6 + $0x8] sm:$0xff] }
  0x70   : > { %2818 = vmatpush.xpose.msk.msrb.mxu1 %vm542_vm0, %v2785_v2  ;;  %1376 = vperm.xlu0 %2983, %v1366_v54  }
  0x71   : > { %1411 = vperm.xlu2 %2985, %v1373_v55  }
  0x72   : > { %2795 = vmatpush.xpose.msk.msrb.mxu0 %vm542_vm0, %v2768_v4 }
  0x73   : > { %2739 = vmatpush.xpose.msk.msrb.mxu3 %vm542_vm0, %v503_v3  ;;  %v1972_v3 = vld [vmem:[#allocation2] sm:$0x1] }
  0x74   : > { %2819 = vmatpush.xpose.msk.msrb.mxu1 %vm542_vm0, %v2784_v5 }
  0x75   : > { %2681 = vmatmul.msk.f32.gmra.mxu0 %vm542_vm0, %v3626_v8 }
  0x76   : > { %2796 = vmatpush.xpose.msk.msrb.mxu0 %vm542_vm0, %v2767_v7  ;;  %2729 = vmatmul.msk.f32.gmra.mxu3 %vm542_vm0, %v3626_v8 }
  0x77   : > { %2740 = vmatpush.xpose.msk.msrb.mxu3 %vm542_vm0, %v502_v6  ;;  %2705 = vmatmul.msk.f32.gmra.mxu1 %vm542_vm0, %v3626_v8 }
  0x78   : > { %2820 = vmatpush.xpose.msk.msrb.mxu1 %vm542_vm0, %v2783_v9  ;;  %1693 = vperm.xlu0 %2983, %v1675_v57  }
  0x7a   : > { %2797 = vmatpush.xpose.msk.msrb.mxu0 %vm542_vm0, %v2766_v11 }
  0x7b   : > { %2741 = vmatpush.xpose.msk.msrb.mxu3 %vm542_vm0, %v501_v10 }
  0x7c   : > { %2821 = vmatpush.xpose.msk.msrb.mxu1 %vm542_vm0, %v2782_v14 }
  0x7d   : > { %2682 = vmatmul.msk.f32.gmra.mxu0 %vm542_vm0, %v3652_v17 }
  0x7e   : > { %2798 = vmatpush.xpose.msk.msrb.mxu0 %vm542_vm0, %v2765_v16  ;;  %2730 = vmatmul.msk.f32.gmra.mxu3 %vm542_vm0, %v3652_v17 }
  0x7f   : > { %2742 = vmatpush.xpose.msk.msrb.mxu3 %vm542_vm0, %v500_v15  ;;  %2706 = vmatmul.msk.f32.gmra.mxu1 %vm542_vm0, %v3652_v17 }
  0x80   : > { %2822 = vmatpush.xpose.msk.msrb.mxu1 %vm542_vm0, %v2781_v18  ;;  %1718 = vperm.xlu0 %2983, %v1680_v60  }
  0x82   : > { %2799 = vmatpush.xpose.msk.msrb.mxu0 %vm542_vm0, %v2764_v20 }
  0x83   : > { %2743 = vmatpush.xpose.msk.msrb.mxu3 %vm542_vm0, %v499_v19 }
  0x84   : > { %2823 = vmatpush.xpose.msk.msrb.mxu1 %vm542_vm0, %v2780_v23 }
  0x85   : > { %2683 = vmatmul.msk.f32.gmra.mxu0 %vm542_vm0, %v3681_v26 }
  0x86   : > { %2800 = vmatpush.xpose.msk.msrb.mxu0 %vm542_vm0, %v2763_v25  ;;  %2731 = vmatmul.msk.f32.gmra.mxu3 %vm542_vm0, %v3681_v26 }
  0x87   : > { %2744 = vmatpush.xpose.msk.msrb.mxu3 %vm542_vm0, %v498_v24  ;;  %2707 = vmatmul.msk.f32.gmra.mxu1 %vm542_vm0, %v3681_v26 }
  0x88   : > { %2824 = vmatpush.xpose.msk.msrb.mxu1 %vm542_vm0, %v2779_v27 }
  0x8a   : > { %2801 = vmatpush.xpose.msk.msrb.mxu0 %vm542_vm0, %v2762_v29 }
  0x8b   : > { %2745 = vmatpush.xpose.msk.msrb.mxu3 %vm542_vm0, %v497_v28 }
  0x8c   : > { %2825 = vmatpush.xpose.msk.msrb.mxu1 %vm542_vm0, %v2778_v32 }
  0x8d   : > { %2684 = vmatmul.msk.f32.gmra.mxu0 %vm542_vm0, %v3710_v35 }
  0x8e   : > { %2802 = vmatpush.xpose.msk.msrb.mxu0 %vm542_vm0, %v2761_v34  ;;  %2732 = vmatmul.msk.f32.gmra.mxu3 %vm542_vm0, %v3710_v35 }
  0x8f   : > { %2746 = vmatpush.xpose.msk.msrb.mxu3 %vm542_vm0, %v496_v33  ;;  %2708 = vmatmul.msk.f32.gmra.mxu1 %vm542_vm0, %v3710_v35 }
  0x90   : > { %2826 = vmatpush.xpose.msk.msrb.mxu1 %vm542_vm0, %v2777_v36 }
  0x92   : > { %2803 = vmatpush.xpose.msk.msrb.mxu0 %vm542_vm0, %v2760_v38 }
  0x93   : > { %2747 = vmatpush.xpose.msk.msrb.mxu3 %vm542_vm0, %v495_v37 }
  0x94   : > { %2827 = vmatpush.xpose.msk.msrb.mxu1 %vm542_vm0, %v2776_v40 }
  0x95   : > { %2685 = vmatmul.msk.f32.gmra.mxu0 %vm542_vm0, %v3736_v43 }
  0x96   : > { %2804 = vmatpush.xpose.msk.msrb.mxu0 %vm542_vm0, %v2759_v42  ;;  %2733 = vmatmul.msk.f32.gmra.mxu3 %vm542_vm0, %v3736_v43 }
  0x97   : > { %2748 = vmatpush.xpose.msk.msrb.mxu3 %vm542_vm0, %v494_v41  ;;  %2709 = vmatmul.msk.f32.gmra.mxu1 %vm542_vm0, %v3736_v43 }
  0x98   : > { %2828 = vmatpush.xpose.msk.msrb.mxu1 %vm542_vm0, %v2775_v44 }
  0x9a   : > { %2805 = vmatpush.xpose.msk.msrb.mxu0 %vm542_vm0, %v2758_v46 }
  0x9b   : > { %2749 = vmatpush.xpose.msk.msrb.mxu3 %vm542_vm0, %v493_v45 }
  0x9c   : > { %2829 = vmatpush.xpose.msk.msrb.mxu1 %vm542_vm0, %v2774_v47 }
  0x9d   : > { %2806 = vmatmul.msk.f32.vlgmr.msrb.gmra.mxu0 %vm542_vm0, %v3557_v51 }
  0x9e   : > { %2750 = vmatmul.msk.f32.vlgmr.msrb.gmra.mxu3 %vm542_vm0, %v3557_v51 }
  0x9f   : > { %2830 = vmatmul.msk.f32.vlgmr.msrb.gmra.mxu1 %vm542_vm0, %v3557_v51  ;;  %v1368_v51 = vld [vmem:[%s4479_s4 + $0x10] sm:$0xff] }
  0xa0   : > { %1386 = vperm.xlu1 %2984, %v1368_v51  }
  0xa5   : > { %2807 = vmatmul.msk.f32.gmra.mxu0 %vm542_vm0, %v3580_v58 }
  0xa6   : > { %2751 = vmatmul.msk.f32.gmra.mxu3 %vm542_vm0, %v3580_v58 }
  0xa7   : > { %2831 = vmatmul.msk.f32.gmra.mxu1 %vm542_vm0, %v3580_v58  ;;  %v1370_v58 = vld [vmem:[%s4479_s4 + $0x20] sm:$0xff] }
  0xa8   : > { %1683 = vperm.xlu1 %2984, %v1673_v56   ;;  %1396 = vperm.xlu2 %2985, %v1370_v58   ;;  %v3879_v40 = vpop.permute.xlu1 %1185 }
  0xab   : > { %v3887_v46 = vpop.permute.xlu0 %1195 }
  0xad   : > { %2808 = vmatmul.msk.f32.gmra.mxu0 %vm542_vm0, %v3603_v1 }
  0xae   : > { %2752 = vmatmul.msk.f32.gmra.mxu3 %vm542_vm0, %v3603_v1 }
  0xaf   : > { %2832 = vmatmul.msk.f32.gmra.mxu1 %vm542_vm0, %v3603_v1  ;;  %v1679_v1 = vld [vmem:[%s4481_s6 + $0x30] sm:$0xff] }
  0xb0   : > { %1698 = vperm.xlu1 %2984, %v1676_v59   ;;  %1381 = vperm.xlu2 %2985, %v1367_v61   ;;  %v3885_v44 = vpop.permute.xlu1 %1180 }
  0xb5   : > { %2809 = vmatmul.msk.f32.gmra.mxu0 %vm542_vm0, %v3626_v8 }
  0xb6   : > { %2753 = vmatmul.msk.f32.gmra.mxu3 %vm542_vm0, %v3626_v8 }
  0xb7   : > { %2833 = vmatmul.msk.f32.gmra.mxu1 %vm542_vm0, %v3626_v8  ;;  %v1191_v55 = vpop.permute.xlu0 %1190 }
  0xb8   : > { %1708 = vperm.xlu1 %2984, %v1678_v62   ;;  %1688 = vperm.xlu2 %2985, %v1674_v63  }
  0xb9   : > { %v3893_v51 = vpop.permute.xlu1 %1160 }
  0xbb   : > { %v3891_v53 = vpop.permute.xlu2 %1175 }
  0xbd   : > { %2810 = vmatmul.msk.f32.gmra.mxu0 %vm542_vm0, %v3652_v17 }
  0xbe   : > { %2754 = vmatmul.msk.f32.gmra.mxu3 %vm542_vm0, %v3652_v17 }
  0xbf   : > { %2834 = vmatmul.msk.f32.gmra.mxu1 %vm542_vm0, %v3652_v17 }
  0xc0   : > { %1703 = vperm.xlu2 %2985, %v1677_v0  }
  0xc5   : > { %2811 = vmatmul.msk.f32.gmra.mxu0 %vm542_vm0, %v3681_v26 }
  0xc6   : > { %2755 = vmatmul.msk.f32.gmra.mxu3 %vm542_vm0, %v3681_v26 }
  0xc7   : > { %2835 = vmatmul.msk.f32.gmra.mxu1 %vm542_vm0, %v3681_v26 }
  0xc8   : > { %1713 = vperm.xlu2 %2985, %v1679_v1  }
  0xcd   : > { %2812 = vmatmul.msk.f32.gmra.mxu0 %vm542_vm0, %v3710_v35 }
  0xce   : > { %2756 = vmatmul.msk.f32.gmra.mxu3 %vm542_vm0, %v3710_v35 }
  0xcf   : > { %2836 = vmatmul.msk.f32.gmra.mxu1 %vm542_vm0, %v3710_v35 }
  0xd0   : > { %1975 = vperm.xlu2 %2985, %v1972_v3  }
  0xd5   : > { %2813 = vmatmul.msk.f32.gmra.mxu0 %vm542_vm0, %v3736_v43 }
  0xd6   : > { %2757 = vmatmul.msk.f32.gmra.mxu3 %vm542_vm0, %v3736_v43 }
  0xd7   : > { %2837 = vmatmul.msk.f32.gmra.mxu1 %vm542_vm0, %v3736_v43 }
  0xda   : > { %v680_v2 = vpop.f32.mrf.mxu0 }
  0xdc   : > { %v721_v4 = vpop.f32.mrf.mxu1 }
  0xe1   : > { %v858_v5 = vpop.f32.mrf.mxu3 }
  0xe2   : > { %v683_v6 = vpop.f32.mrf.mxu0  ;;  %v859_v49 = vadd.f32 %v858_v5, %v680_v2 }
  0xe4   : > { %v3857_v7 = vpop.f32.mrf.mxu1 }
  0xe9   : > { %v861_v8 = vpop.f32.mrf.mxu3 }
  0xea   : > { %v686_v9 = vpop.f32.mrf.mxu0  ;;  %v862_v3 = vadd.f32 %v861_v8, %v683_v6 }
  0xec   : > { %v3859_v10 = vpop.f32.mrf.mxu1 }
  0xf1   : > { %v864_v11 = vpop.f32.mrf.mxu3 }
  0xf2   : > { %v689_v12 = vpop.f32.mrf.mxu0  ;;  %v865_v61 = vadd.f32 %v864_v11, %v686_v9  ;;  %v3911_v11 = vpop.permute.xlu0 %1165 }
  0xf4   : > { %v3861_v13 = vpop.f32.mrf.mxu1 }
  0xf9   : > { %v867_v14 = vpop.f32.mrf.mxu3 }
  0xfa   : > { %v868_v15 = vadd.f32 %v867_v14, %v689_v12  ;;  %v692_v16 = vpop.f32.mrf.mxu0 }
  0xfc   : > { %v3863_v17 = vpop.f32.mrf.mxu1 }
 0x101   : > { %v870_v18 = vpop.f32.mrf.mxu3 }
 0x102   : > { %v871_v19 = vadd.f32 %v870_v18, %v692_v16  ;;  %v695_v20 = vpop.f32.mrf.mxu0  ;;  %v3906_v18 = vpop.permute.xlu2 %1170 }
 0x104   : > { %v3865_v21 = vpop.f32.mrf.mxu1 }
 0x109   : > { %v873_v22 = vpop.f32.mrf.mxu3 }
 0x10a   : > { %v874_v23 = vadd.f32 %v873_v22, %v695_v20  ;;  %v698_v24 = vpop.f32.mrf.mxu0 }
 0x10c   : > { %v3867_v25 = vpop.f32.mrf.mxu1 }
 0x111   : > { %v876_v26 = vpop.f32.mrf.mxu3 }
 0x112   : > { %v701_v27 = vpop.f32.mrf.mxu0  ;;  %v877_v0 = vadd.f32 %v876_v26, %v698_v24 }
 0x114   : > { %v3869_v28 = vpop.f32.mrf.mxu1 }
 0x119   : > { %v879_v29 = vpop.f32.mrf.mxu3 }
 0x11a   : > { %v1069_v30 = vpop.f32.mrf.mxu0  ;;  %v880_v24 = vadd.f32 %v879_v29, %v701_v27 }
 0x11b   : > { %v1134_v52 = vadd.f32 %v1069_v30, %v859_v49 }
 0x11c   : > { %v1110_v31 = vpop.f32.mrf.mxu1 }
 0x11d   : > { %v3896_v57 = vadd.f32 %v3893_v51, %v1134_v52 }
 0x11f   : > { %v1230_v1 = vand.u32 2147483647, %v3896_v57 }
 0x121   : > { %v899_v32 = vpop.f32.mrf.mxu3  ;;  %v1246_v9 = vsub.f32 0.0, %v1230_v1 }
 0x122   : > { %v900_v33 = vadd.f32 %v899_v32, %v721_v4  ;;  %v1072_v34 = vpop.f32.mrf.mxu0 }
 0x123   : > { %v1136_v16 = vadd.f32 %v1072_v34, %v862_v3  ;;  %v1262_v32 = vmul.f32 1.442695, %v1246_v9 }
 0x124   : > { %v3871_v35 = vadd.f32 %v1110_v31, %v900_v33  ;;  %v3873_v36 = vpop.f32.mrf.mxu1 }
 0x125   : > { %v3921_v26 = vadd.f32 %v3911_v11, %v1136_v16  ;;  %2987 = vpow2.f32 %v1262_v32 }
 0x127   : > { %v1232_v27 = vand.u32 2147483647, %v3921_v26 }
 0x129   : > { %v3875_v37 = vpop.f32.mrf.mxu3  ;;  %v1248_v3 = vsub.f32 0.0, %v1232_v27 }
 0x12a   : > { %v1075_v38 = vpop.f32.mrf.mxu0 }
 0x12b   : > { %v1138_v2 = vadd.f32 %v1075_v38, %v865_v61  ;;  %v2988_v9 = vpop.eup %2987 }
 0x12c   : > { %v3877_v39 = vpop.f32.mrf.mxu1 }
 0x131   : > { %v3881_v41 = vpop.f32.mrf.mxu3 }
 0x132   : > { %v1078_v42 = vpop.f32.mrf.mxu0 }
 0x133   : > { %v1140_v62 = vadd.f32 %v1078_v42, %v868_v15  ;;  %v3914_v15 = vadd.f32 %v3906_v18, %v1138_v2 }
 0x134   : > { %v3883_v43 = vpop.f32.mrf.mxu1 }
 0x135   : > { %v1234_v33 = vand.u32 2147483647, %v3914_v15 }
 0x139   : > { %v908_v45 = vpop.f32.mrf.mxu3 }
 0x13a   : > { %v1081_v47 = vpop.f32.mrf.mxu0 }
 0x13b   : > { %v1142_v59 = vadd.f32 %v1081_v47, %v871_v19  ;;  %v3909_v19 = vadd.f32 %v3891_v53, %v1140_v62  ;;  %v1250_v62 = vsub.f32 0.0, %v1234_v33 }
 0x13c   : > { %v3889_v48 = vpop.f32.mrf.mxu1 }
 0x13d   : > { %v3903_v4 = vadd.f32 %v3885_v44, %v1142_v59  ;;  %v1236_v30 = vand.u32 2147483647, %v3909_v19  ;;  %v1270_v16 = vmul.f32 1.442695, %v1250_v62 }
 0x13f   : > { %v1238_v8 = vand.u32 2147483647, %v3903_v4  ;;  %v1252_v29 = vsub.f32 0.0, %v1236_v30 }
 0x141   : > { %v911_v50 = vpop.f32.mrf.mxu3  ;;  %v1254_v42 = vsub.f32 0.0, %v1238_v8 }
 0x142   : > { %v1084_v54 = vpop.f32.mrf.mxu0  ;;  %v912_v59 = vadd.f32 %v911_v50, %v3863_v17 }
 0x143   : > { %v1144_v56 = vadd.f32 %v1084_v54, %v874_v23  ;;  %v1278_v1 = vmul.f32 1.442695, %v1254_v42 }
 0x144   : > { %v1125_v58 = vpop.f32.mrf.mxu1  ;;  %v1143_v17 = vadd.f32 %v3889_v48, %v912_v59 }
 0x145   : > { %v3899_v60 = vadd.f32 %v3879_v40, %v1144_v56 }
 0x147   : > { %v1240_v5 = vand.u32 2147483647, %v3899_v60 }
 0x149   : > { %v914_v63 = vpop.f32.mrf.mxu3  ;;  %v1256_v20 = vsub.f32 0.0, %v1240_v5  ;;  %v1274_v5 = vmul.f32 1.442695, %v1252_v29 }
 0x14a   : > { %v1087_v12 = vpop.f32.mrf.mxu0  ;;  %v915_v49 = vadd.f32 %v914_v63, %v3865_v21  ;;  %v906_v21 = vadd.f32 %v3881_v41, %v3859_v10 }
 0x14b   : > { %v1146_v14 = vadd.f32 %v1087_v12, %v877_v0  ;;  %v1282_v47 = vmul.f32 1.442695, %v1256_v20 }
 0x14c   : > { %v1128_v22 = vpop.f32.mrf.mxu1  ;;  %v1145_v2 = vadd.f32 %v1125_v58, %v915_v49  ;;  %v1139_v48 = vadd.f32 %v3877_v39, %v906_v21 }
 0x14d   : > { %v3916_v6 = vadd.f32 %v1191_v55, %v1146_v14  ;;  %2989 = vpow2.f32 %v1282_v47 }
 0x14e   : > { %v3944_v41 = vadd.f32 %v3879_v40, %v1145_v2  ;;  %v3960_v30 = vadd.f32 %v3906_v18, %v1139_v48 }
 0x14f   : > { %v1242_v23 = vand.u32 2147483647, %v3916_v6 }
 0x151   : > { %v917_v31 = vpop.f32.mrf.mxu3  ;;  %v1258_v34 = vsub.f32 0.0, %v1242_v23 }
 0x152   : > { %v918_v38 = vadd.f32 %v917_v31, %v3867_v25  ;;  %v1090_v52 = vpop.f32.mrf.mxu0  ;;  %v909_v25 = vadd.f32 %v908_v45, %v3861_v13  ;;  %v903_v13 = vadd.f32 %v3875_v37, %v3857_v7  ;;  %v3948_v7 = vadd.f32 %v3885_v44, %v1143_v17 }
 0x153   : > { %v1286_v54 = vmul.f32 1.442695, %v1258_v34  ;;  %v1148_v56 = vadd.f32 %v1090_v52, %v880_v24  ;;  %v2990_v20 = vpop.eup %2989  ;;  %v1241_v24 = vand.u32 2147483647, %v3944_v41  ;;  %v3966_v34 = vadd.f32 %v3893_v51, %v3871_v35 }
 0x154   : > { %v1147_v61 = vadd.f32 %v1128_v22, %v918_v38  ;;  %v1131_v14 = vpop.f32.mrf.mxu1  ;;  %v1141_v10 = vadd.f32 %v3883_v43, %v909_v25  ;;  %v1266_v22 = vmul.f32 1.442695, %v1248_v3  ;;  %v1137_v23 = vadd.f32 %v3873_v36, %v903_v13 }
 0x155   : > { %v3930_v0 = vadd.f32 %v3887_v46, %v1148_v56  ;;  %2991 = vpow2.f32 %v1286_v54  ;;  %v1294_v43 = vadd.f32 1.0, %v2988_v9  ;;  %v1304_v44 = vadd.f32 1.0, %v2990_v20 }
 0x156   : > { %v3937_v50 = vadd.f32 %v1191_v55, %v1147_v61  ;;  %2993 = vpow2.f32 %v1278_v1  ;;  %v3956_v39 = vadd.f32 %v3891_v53, %v1141_v10  ;;  %v1239_v36 = vand.u32 2147483647, %v3948_v7 }
 0x157   : > { %v1244_v63 = vand.u32 2147483647, %v3930_v0  ;;  %2995 = vpow2.f32 %v1274_v5  ;;  %v3969_v42 = vadd.f32 %v3911_v11, %v1137_v23  ;;  %v1257_v47 = vsub.f32 0.0, %v1241_v24 }
 0x158   : > { %v1237_v18 = vand.u32 2147483647, %v3956_v39  ;;  %v1235_v52 = vand.u32 2147483647, %v3960_v30  ;;  %v1255_v29 = vsub.f32 0.0, %v1239_v36  ;;  %v1228_v48 = vmax.f32 %v3930_v0, 0.0 }
 0x159   : > { %v920_v12 = vpop.f32.mrf.mxu3  ;;  %v1260_v45 = vsub.f32 0.0, %v1244_v63  ;;  %v1233_v11 = vand.u32 2147483647, %v3969_v42  ;;  %v1284_v25 = vmul.f32 1.442695, %v1257_v47  ;;  %v1224_v36 = vmax.f32 %v3899_v60, 0.0 }
 0x15a   : > { %v921_v58 = vadd.f32 %v920_v12, %v3869_v28  ;;  %v1243_v28 = vand.u32 2147483647, %v3937_v50  ;;  %v1253_v62 = vsub.f32 0.0, %v1237_v18  ;;  %v1231_v21 = vand.u32 2147483647, %v3966_v34 }
 0x15b   : > { %v1290_v55 = vmul.f32 1.442695, %v1260_v45  ;;  %v2992_v37 = vpop.eup %2991  ;;  %v1251_v63 = vsub.f32 0.0, %v1235_v52  ;;  %v1280_v3 = vmul.f32 1.442695, %v1255_v29  ;;  %v1220_v60 = vmax.f32 %v3909_v19, 0.0 }
 0x15c   : > { %v1149_v8 = vadd.f32 %v1131_v14, %v921_v58  ;;  %v2994_v32 = vpop.eup %2993  ;;  %v1306_v33 = vadd.f32 1.0, %v2992_v37  ;;  %v1249_v14 = vsub.f32 0.0, %v1233_v11  ;;  %v1276_v13 = vmul.f32 1.442695, %v1253_v62 }
 0x15d   : > { %2997 = vpow2.f32 %v1290_v55  ;;  %v2996_v38 = vpop.eup %2995  ;;  %v1302_v54 = vadd.f32 1.0, %v2994_v32  ;;  %v1272_v10 = vmul.f32 1.442695, %v1251_v63  ;;  %v1226_v37 = vmax.f32 %v3916_v6, 0.0 }
 0x15e   : > { %v3953_v40 = vadd.f32 %v3887_v46, %v1149_v8  ;;  %2999 = vpow2.f32 %v1270_v16  ;;  %v1259_v46 = vsub.f32 0.0, %v1243_v28  ;;  %v1300_v51 = vadd.f32 1.0, %v2996_v38 }
 0x15f   : > { %3001 = vpow2.f32 %v1266_v22  ;;  %v1247_v16 = vsub.f32 0.0, %v1231_v21  ;;  %v1268_v22 = vmul.f32 1.442695, %v1249_v14  ;;  %v1222_v38 = vmax.f32 %v3903_v4, 0.0 }
 0x160   : > { %v1245_v31 = vand.u32 2147483647, %v3953_v40  ;;  %3003 = vlog2.f32 %v1294_v43  ;;  %v1288_v35 = vmul.f32 1.442695, %v1259_v46  ;;  %v1218_v29 = vmax.f32 %v3914_v15, 0.0 }
 0x161   : > { %3005 = vlog2.f32 %v1304_v44  ;;  %v1216_v19 = vmax.f32 %v3921_v26, 0.0  ;;  %v1214_v63 = vmax.f32 %v3896_v57, 0.0  ;;  %v1229_v57 = vmax.f32 %v3953_v40, 0.0 }
 0x162   : > { %v1261_v53 = vsub.f32 0.0, %v1245_v31  ;;  %3007 = vlog2.f32 %v1306_v33  ;;  %v1264_v31 = vmul.f32 1.442695, %v1247_v16 }
 0x163   : > { %v2998_v49 = vpop.eup %2997 }
 0x164   : > { %v1292_v56 = vmul.f32 1.442695, %v1261_v53  ;;  %v3000_v27 = vpop.eup %2999  ;;  %v1308_v59 = vadd.f32 1.0, %v2998_v49 }
 0x165   : > { %v3002_v61 = vpop.eup %3001  ;;  %v1298_v1 = vadd.f32 1.0, %v3000_v27 }
 0x166   : > { %3009 = vpow2.f32 %v1292_v56  ;;  %v3974_v2 = vpop.eup %3003  ;;  %v1296_v17 = vadd.f32 1.0, %v3002_v61 }
 0x167   : > { %3011 = vlog2.f32 %v1308_v59  ;;  %v3006_v5 = vpop.eup %3005 }
 0x168   : > { %3013 = vlog2.f32 %v1302_v54  ;;  %v3008_v12 = vpop.eup %3007  ;;  %v1331_v24 = vmul.f32 0.6931472, %v3006_v5 }
 0x169   : > { %3015 = vpow2.f32 %v1288_v35  ;;  %v1335_v8 = vmul.f32 0.6931472, %v3008_v12 }
 0x16a   : > { %3017 = vlog2.f32 %v1300_v51  ;;  %v1352_v47 = vadd.f32 %v1331_v24, %v1224_v36  ;;  %v1221_v24 = vmax.f32 %v3956_v39, 0.0  ;;  %v1219_v36 = vmax.f32 %v3960_v30, 0.0 }
 0x16b   : > { %3019 = vpow2.f32 %v1284_v25  ;;  %v1354_v0 = vadd.f32 %v1335_v8, %v1226_v37  ;;  %v1217_v39 = vmax.f32 %v3969_v42, 0.0  ;;  %v1363_v42 = vld [vmem:[%s4478_s3 + $0x28] sm:$0xff] }
 0x16c   : > { %v3010_v45 = vpop.eup %3009  ;;  %3021 = vlog2.f32 %v1298_v1  ;;  %v1311_v1 = vmul.f32 0.6931472, %v3974_v2  ;;  %v1358_v2 = vld [vmem:[%s4478_s3] sm:$0xff] }
 0x16d   : > { %v3012_v58 = vpop.eup %3011  ;;  %3023 = vpow2.f32 %v1280_v3  ;;  %v1309_v43 = vadd.f32 1.0, %v3010_v45  ;;  %v1364_v45 = vld [vmem:[%s4478_s3 + $0x30] sm:$0xff] }
 0x16e   : > { %v3014_v9 = vpop.eup %3013  ;;  %3025 = vlog2.f32 %v1296_v17  ;;  %v1339_v55 = vmul.f32 0.6931472, %v3012_v58  ;;  %v1342_v14 = vadd.f32 %v1311_v1, %v1214_v63 }
 0x16f   : > { %v3016_v20 = vpop.eup %3015  ;;  %3027 = vpow2.f32 %v1276_v13  ;;  %v1327_v46 = vmul.f32 0.6931472, %v3014_v9  ;;  %v1360_v13 = vld [vmem:[%s4478_s3 + $0x10] sm:$0xff] }
 0x170   : > { %v3018_v28 = vpop.eup %3017  ;;  %v1356_v23 = vadd.f32 %v1339_v55, %v1228_v48  ;;  %3029 = vpow2.f32 %v1272_v10  ;;  %v1307_v33 = vadd.f32 1.0, %v3016_v20  ;;  %v1227_v10 = vmax.f32 %v3937_v50, 0.0 }
 0x171   : > { %v3020_v44 = vpop.eup %3019  ;;  %3031 = vpow2.f32 %v1268_v22  ;;  %v1323_v49 = vmul.f32 0.6931472, %v3018_v28  ;;  %v1350_v56 = vadd.f32 %v1327_v46, %v1222_v38  ;;  %v1225_v55 = vmax.f32 %v3944_v41, 0.0  ;;  %v1361_v41 = vld [vmem:[%s4478_s3 + $0x18] sm:$0xff] }
 0x172   : > { %v3022_v32 = vpop.eup %3021  ;;  %1447 = vmatpush.msra.mxu0 %v1356_v23  ;;  %2909 = vmatpush.msra.mxu1 %v1356_v23  ;;  %v1305_v18 = vadd.f32 1.0, %v3020_v44  ;;  %3033 = vlog2.f32 %v1309_v43  ;;  %v1223_v28 = vmax.f32 %v3948_v7, 0.0  ;;  %v1359_v43 = vld [vmem:[%s4478_s3 + $0x8] sm:$0xff]  ;;  %v1365_v7 = vld [vmem:[%s4478_s3 + $0x38] sm:$0xff]  ;;  %v1215_v38 = vmax.f32 %v3966_v34, 0.0  ;;  %v4034_v34 = vpop.permute.xlu2 %1411 }
 0x173   : > { %v3024_v53 = vpop.eup %3023  ;;  %2910 = vmatpush.msra.mxu3 %v1356_v23  ;;  %3035 = vpow2.f32 %v1264_v31  ;;  %v1319_v27 = vmul.f32 0.6931472, %v3022_v32  ;;  %v1348_v35 = vadd.f32 %v1323_v49, %v1220_v60 }
 0x174   : > { %v3026_v6 = vpop.eup %3025  ;;  %1448 = vmatpush.msra.mxu0 %v1354_v0  ;;  %2911 = vmatpush.msra.mxu1 %v1354_v0  ;;  %v1303_v54 = vadd.f32 1.0, %v3024_v53  ;;  %3037 = vlog2.f32 %v1307_v33 }
 0x175   : > { %v3028_v52 = vpop.eup %3027  ;;  %2912 = vmatpush.msra.mxu3 %v1354_v0  ;;  %v1315_v51 = vmul.f32 0.6931472, %v3026_v6  ;;  %3039 = vlog2.f32 %v1305_v18  ;;  %v1346_v25 = vadd.f32 %v1319_v27, %v1218_v29  ;;  %v1362_v18 = vld [vmem:[%s4478_s3 + $0x20] sm:$0xff] }
 0x176   : > { %1449 = vmatpush.msra.mxu0 %v1352_v47  ;;  %2913 = vmatpush.msra.mxu1 %v1352_v47  ;;  %v3030_v4 = vpop.eup %3029  ;;  %v1301_v59 = vadd.f32 1.0, %v3028_v52  ;;  %3041 = vlog2.f32 %v1303_v54  ;;  %v4038_v52 = vpop.permute.xlu1 %1401 }
 0x177   : > { %2914 = vmatpush.msra.mxu3 %v1352_v47  ;;  %v3032_v61 = vpop.eup %3031  ;;  %v1299_v62 = vadd.f32 1.0, %v3030_v4  ;;  %v1344_v5 = vadd.f32 %v1315_v51, %v1216_v19  ;;  %v4036_v47 = vpop.permute.xlu0 %1406 }
 0x178   : > { %1450 = vmatpush.msra.mxu0 %v1350_v56  ;;  %2915 = vmatpush.msra.mxu1 %v1350_v56  ;;  %v3034_v11 = vpop.eup %3033  ;;  %v1297_v3 = vadd.f32 1.0, %v3032_v61  ;;  %3043 = vlog2.f32 %v1301_v59 }
 0x179   : > { %2916 = vmatpush.msra.mxu3 %v1350_v56  ;;  %v3036_v15 = vpop.eup %3035  ;;  %v1341_v26 = vmul.f32 0.6931472, %v3034_v11  ;;  %3045 = vlog2.f32 %v1299_v62 }
 0x17a   : > { %1451 = vmatpush.msra.mxu0 %v1348_v35  ;;  %2917 = vmatpush.msra.mxu1 %v1348_v35  ;;  %v3038_v21 = vpop.eup %3037  ;;  %v1295_v12 = vadd.f32 1.0, %v3036_v15  ;;  %3047 = vlog2.f32 %v1297_v3  ;;  %v4040_v54 = vpop.permute.xlu2 %1396 }
 0x17b   : > { %2918 = vmatpush.msra.mxu3 %v1348_v35  ;;  %v3040_v17 = vpop.eup %3039  ;;  %v1337_v58 = vmul.f32 0.6931472, %v3038_v21  ;;  %v1357_v9 = vadd.f32 %v1341_v26, %v1229_v57 }
 0x17c   : > { %1452 = vmatpush.msra.mxu0 %v1346_v25  ;;  %2919 = vmatpush.msra.mxu1 %v1346_v25  ;;  %v3042_v16 = vpop.eup %3041  ;;  %v1333_v40 = vmul.f32 0.6931472, %v3040_v17  ;;  %3049 = vlog2.f32 %v1295_v12 }
 0x17d   : > { %2920 = vmatpush.msra.mxu3 %v1346_v25  ;;  %v1355_v8 = vadd.f32 %v1337_v58, %v1227_v10  ;;  %v1329_v20 = vmul.f32 0.6931472, %v3042_v16 }
 0x17e   : > { %1453 = vmatpush.msra.mxu0 %v1344_v5  ;;  %2921 = vmatpush.msra.mxu1 %v1344_v5  ;;  %v3044_v48 = vpop.eup %3043  ;;  %v1353_v50 = vadd.f32 %v1333_v40, %v1225_v55  ;;  %v4048_v51 = vpop.permute.xlu1 %1386 }
 0x17f   : > { %2922 = vmatpush.msra.mxu3 %v1344_v5  ;;  %v3046_v22 = vpop.eup %3045  ;;  %v1325_v37 = vmul.f32 0.6931472, %v3044_v48  ;;  %v1351_v44 = vadd.f32 %v1329_v20, %v1223_v28  ;;  %v4045_v4 = vpop.permute.xlu0 %1391 }
 0x180   : > { %1454 = vmatpush.msra.mxu0 %v1342_v14  ;;  %2923 = vmatpush.msra.mxu1 %v1342_v14  ;;  %v3048_v23 = vpop.eup %3047  ;;  %v1321_v31 = vmul.f32 0.6931472, %v3046_v22 }
 0x181   : > { %2924 = vmatpush.msra.mxu3 %v1342_v14  ;;  %2838 = vmatmul.msk.f32.vlgmr.msra.gmra.mxu0 %vm1414_vm1, %v1358_v2  ;;  %v1349_v33 = vadd.f32 %v1325_v37, %v1221_v24  ;;  %v1317_v0 = vmul.f32 0.6931472, %v3048_v23 }
 0x182   : > { %2840 = vmatmul.msk.f32.vlgmr.msra.gmra.mxu1 %vm1414_vm1, %v1360_v13  ;;  %2844 = vmatmul.msk.f32.vlgmr.msra.gmra.mxu3 %vm1414_vm1, %v1364_v45  ;;  %v3050_v32 = vpop.eup %3049  ;;  %v1347_v46 = vadd.f32 %v1321_v31, %v1219_v36  ;;  %v4056_v25 = vpop.permute.xlu2 %1381 }
 0x183   : > { %1488 = vmatpush.msrb.mxu3 %v1357_v9  ;;  %v1313_v53 = vmul.f32 0.6931472, %v3050_v32  ;;  %v1345_v6 = vadd.f32 %v1317_v0, %v1217_v39 }
 0x185   : > { %1489 = vmatpush.msrb.mxu3 %v1355_v8  ;;  %v1343_v30 = vadd.f32 %v1313_v53, %v1215_v38 }
 0x187   : > { %1490 = vmatpush.msrb.mxu3 %v1353_v50  ;;  %v4070_v12 = vpop.permute.xlu0 %1376 }
 0x189   : > { %1491 = vmatpush.msrb.mxu3 %v1351_v44  ;;  %2839 = vmatmul.msk.f32.gmra.mxu0 %vm1414_vm1, %v1359_v43 }
 0x18a   : > { %2841 = vmatmul.msk.f32.gmra.mxu1 %vm1414_vm1, %v1361_v41  ;;  %2845 = vmatmul.msk.f32.gmra.mxu3 %vm1414_vm1, %v1365_v7 }
 0x18b   : > { %1492 = vmatpush.msrb.mxu3 %v1349_v33 }
 0x18d   : > { %1493 = vmatpush.msrb.mxu3 %v1347_v46 }
 0x18f   : > { %1494 = vmatpush.msrb.mxu3 %v1345_v6 }
 0x191   : > { %1495 = vmatpush.msrb.mxu3 %v1343_v30 }
 0x192   : > { %2842 = vmatmul.msk.f32.gmra.mxu1 %vm1414_vm1, %v1362_v18  ;;  %2846 = vmatmul.msk.f32.vlgmr.msrb.gmra.mxu3 %vm1414_vm1, %v1358_v2 }
 0x19a   : > { %2843 = vmatmul.msk.f32.gmra.mxu1 %vm1414_vm1, %v1363_v42  ;;  %2847 = vmatmul.msk.f32.gmra.mxu3 %vm1414_vm1, %v1359_v43 }
 0x1a2   : > { %2848 = vmatmul.msk.f32.gmra.mxu3 %vm1414_vm1, %v1360_v13 }
 0x1aa   : > { %2849 = vmatmul.msk.f32.gmra.mxu3 %vm1414_vm1, %v1361_v41 }
 0x1b2   : > { %2850 = vmatmul.msk.f32.gmra.mxu3 %vm1414_vm1, %v1362_v18 }
 0x1ba   : > { %2851 = vmatmul.msk.f32.gmra.mxu3 %vm1414_vm1, %v1363_v42 }
 0x1c2   : > { %2852 = vmatmul.msk.f32.gmra.mxu3 %vm1414_vm1, %v1364_v45 }
 0x1ca   : > { %2853 = vmatmul.msk.f32.gmra.mxu3 %vm1414_vm1, %v1365_v7 }
 0x1fe   : > { %v1456_v60 = vpop.f32.mrf.mxu0 }
 0x1ff   : > { %v1462_v49 = vpop.f32.mrf.mxu1  ;;  %v4073_v14 = vadd.f32 %v1456_v60, %v4070_v12 }
 0x200   : > { %v4054_v11 = vadd.f32 %v1462_v49, %v4048_v51 }
 0x201   : > { %v1537_v48 = vand.u32 2147483647, %v4073_v14 }
 0x202   : > { %v1541_v5 = vand.u32 2147483647, %v4054_v11 }
 0x203   : > { %v1553_v23 = vsub.f32 0.0, %v1537_v48 }
 0x204   : > { %v1557_v58 = vsub.f32 0.0, %v1541_v5 }
 0x205   : > { %v1474_v56 = vpop.f32.mrf.mxu3  ;;  %v1569_v32 = vmul.f32 1.442695, %v1553_v23 }
 0x206   : > { %v4043_v27 = vadd.f32 %v1474_v56, %v4036_v47  ;;  %v1459_v61 = vpop.f32.mrf.mxu0  ;;  %v1577_v28 = vmul.f32 1.442695, %v1557_v58 }
 0x207   : > { %v1465_v29 = vpop.f32.mrf.mxu1  ;;  %v4059_v15 = vadd.f32 %v1459_v61, %v4056_v25 }
 0x208   : > { %v1549_v59 = vand.u32 2147483647, %v4043_v27  ;;  %v4051_v19 = vadd.f32 %v1465_v29, %v4045_v4  ;;  %v1533_v61 = vmax.f32 %v4043_v27, 0.0 }
 0x209   : > { %v1539_v2 = vand.u32 2147483647, %v4059_v15  ;;  %v1523_v23 = vmax.f32 %v4059_v15, 0.0 }
 0x20a   : > { %v1565_v35 = vsub.f32 0.0, %v1549_v59  ;;  %v1543_v63 = vand.u32 2147483647, %v4051_v19  ;;  %v1527_v48 = vmax.f32 %v4051_v19, 0.0 }
 0x20b   : > { %v1555_v55 = vsub.f32 0.0, %v1539_v2 }
 0x20c   : > { %v1593_v62 = vmul.f32 1.442695, %v1565_v35  ;;  %v1559_v45 = vsub.f32 0.0, %v1543_v63 }
 0x20d   : > { %v1477_v1 = vpop.f32.mrf.mxu3  ;;  %v1573_v43 = vmul.f32 1.442695, %v1555_v55 }
 0x20e   : > { %v4062_v21 = vadd.f32 %v1477_v1, %v4034_v34  ;;  %3051 = vpow2.f32 %v1593_v62  ;;  %v1581_v20 = vmul.f32 1.442695, %v1559_v45 }
 0x20f   : > { %v1468_v3 = vpop.f32.mrf.mxu1 }
 0x210   : > { %v1551_v26 = vand.u32 2147483647, %v4062_v21  ;;  %v4068_v17 = vadd.f32 %v1468_v3, %v4040_v54  ;;  %v1535_v49 = vmax.f32 %v4062_v21, 0.0 }
 0x212   : > { %v1567_v57 = vsub.f32 0.0, %v1551_v26  ;;  %v1545_v13 = vand.u32 2147483647, %v4068_v17  ;;  %v1529_v27 = vmax.f32 %v4068_v17, 0.0 }
 0x214   : > { %v1597_v16 = vmul.f32 1.442695, %v1567_v57  ;;  %v1561_v10 = vsub.f32 0.0, %v1545_v13  ;;  %v3052_v40 = vpop.eup %3051 }
 0x215   : > { %v4077_v9 = vpop.f32.mrf.mxu3  ;;  %v1613_v37 = vadd.f32 1.0, %v3052_v40 }
 0x216   : > { %3053 = vpow2.f32 %v1597_v16  ;;  %v1585_v8 = vmul.f32 1.442695, %v1561_v10 }
 0x217   : > { %v1471_v22 = vpop.f32.mrf.mxu1 }
 0x218   : > { %v1472_v50 = vadd.f32 %v1471_v22, %v4038_v52  ;;  %3055 = vpow2.f32 %v1585_v8 }
 0x219   : > { %3057 = vpow2.f32 %v1581_v20 }
 0x21a   : > { %v1547_v24 = vand.u32 2147483647, %v1472_v50  ;;  %3059 = vpow2.f32 %v1577_v28  ;;  %v1531_v57 = vmax.f32 %v1472_v50, 0.0  ;;  %v1525_v28 = vmax.f32 %v4054_v11, 0.0 }
 0x21b   : > { %3061 = vlog2.f32 %v1613_v37 }
 0x21c   : > { %v3054_v44 = vpop.eup %3053  ;;  %v1563_v41 = vsub.f32 0.0, %v1547_v24  ;;  %3063 = vpow2.f32 %v1573_v43  ;;  %v1521_v24 = vmax.f32 %v4073_v14, 0.0  ;;  %v4108_v14 = vld [vmem:[%s4480_s5 + $0x8] sm:$0xff] }
 0x21d   : > { %v1615_v7 = vadd.f32 1.0, %v3054_v44  ;;  %v4081_v31 = vpop.f32.mrf.mxu3 }
 0x21e   : > { %v1589_v36 = vmul.f32 1.442695, %v1563_v41  ;;  %v3056_v33 = vpop.eup %3055  ;;  %v4095_v41 = vld [vmem:[%s4480_s5] sm:$0xff] }
 0x21f   : > { %3065 = vlog2.f32 %v1615_v7  ;;  %v3058_v0 = vpop.eup %3057  ;;  %v1609_v53 = vadd.f32 1.0, %v3056_v33 }
 0x220   : > { %3067 = vpow2.f32 %v1589_v36  ;;  %v3060_v39 = vpop.eup %3059  ;;  %v1607_v6 = vadd.f32 1.0, %v3058_v0 }
 0x221   : > { %3069 = vpow2.f32 %v1569_v32  ;;  %v3062_v46 = vpop.eup %3061  ;;  %v1605_v29 = vadd.f32 1.0, %v3060_v39 }
 0x222   : > { %v3064_v38 = vpop.eup %3063  ;;  %v1642_v56 = vmul.f32 0.6931472, %v3062_v46  ;;  %3071 = vlog2.f32 %v1609_v53  ;;  %v4128_v53 = vadd.f32 %v4081_v31, %v4056_v25 }
 0x223   : > { %3073 = vlog2.f32 %v1607_v6  ;;  %v1603_v1 = vadd.f32 1.0, %v3064_v38  ;;  %v4132_v38 = vadd.f32 %v4077_v9, %v4070_v12 }
 0x224   : > { %v1661_v63 = vadd.f32 %v1642_v56, %v1533_v61  ;;  %v1540_v25 = vand.u32 2147483647, %v4128_v53 }
 0x225   : > { %v3066_v30 = vpop.eup %3065  ;;  %v4083_v18 = vpop.f32.mrf.mxu3  ;;  %v1538_v56 = vand.u32 2147483647, %v4132_v38 }
 0x226   : > { %v3068_v42 = vpop.eup %3067  ;;  %v1646_v60 = vmul.f32 0.6931472, %v3066_v30 }
 0x227   : > { %v1611_v59 = vadd.f32 1.0, %v3068_v42  ;;  %v3070_v35 = vpop.eup %3069 }
 0x228   : > { %v1663_v62 = vadd.f32 %v1646_v60, %v1535_v49  ;;  %v1601_v3 = vadd.f32 1.0, %v3070_v35  ;;  %v3072_v5 = vpop.eup %3071  ;;  %v1556_v35 = vsub.f32 0.0, %v1540_v25 }
 0x229   : > { %3075 = vlog2.f32 %v1611_v59  ;;  %v3074_v26 = vpop.eup %3073  ;;  %v1634_v45 = vmul.f32 0.6931472, %v3072_v5 }
 0x22a   : > { %1753 = vmatpush.msrb.mxu0 %v1663_v62  ;;  %3077 = vlog2.f32 %v1605_v29  ;;  %v1630_v10 = vmul.f32 0.6931472, %v3074_v26  ;;  %v1554_v62 = vsub.f32 0.0, %v1538_v56  ;;  %v1575_v5 = vmul.f32 1.442695, %v1556_v35  ;;  %v1672_v35 = vld [vmem:[%s4480_s5 + $0x38] sm:$0xff] }
 0x22b   : > { %3079 = vlog2.f32 %v1603_v1  ;;  %v1657_v55 = vadd.f32 %v1634_v45, %v1529_v27  ;;  %v4155_v27 = vld [vmem:[%s4480_s5 + $0x20] sm:$0xff] }
 0x22c   : > { %1754 = vmatpush.msrb.mxu0 %v1661_v63  ;;  %3081 = vlog2.f32 %v1601_v3  ;;  %v1655_v37 = vadd.f32 %v1630_v10, %v1527_v48  ;;  %v1571_v26 = vmul.f32 1.442695, %v1554_v62  ;;  %v4194_v62 = vpop.permute.xlu2 %1688 }
 0x22d   : > { %v1506_v21 = vpop.f32.mrf.mxu3 }
 0x22e   : > { %v4111_v32 = vadd.f32 %v1506_v21, %v4045_v4 }
 0x22f   : > { %v3076_v2 = vpop.eup %3075 }
 0x230   : > { %v1638_v13 = vmul.f32 0.6931472, %v3076_v2  ;;  %v3078_v58 = vpop.eup %3077  ;;  %v1544_v4 = vand.u32 2147483647, %v4111_v32 }
 0x231   : > { %v3080_v40 = vpop.eup %3079  ;;  %v1626_v8 = vmul.f32 0.6931472, %v3078_v58 }
 0x232   : > { %v1659_v16 = vadd.f32 %v1638_v13, %v1531_v57  ;;  %v3082_v20 = vpop.eup %3081  ;;  %v1622_v50 = vmul.f32 0.6931472, %v3080_v40  ;;  %v1560_v42 = vsub.f32 0.0, %v1544_v4 }
 0x233   : > { %v1653_v43 = vadd.f32 %v1626_v8, %v1525_v28  ;;  %v1618_v17 = vmul.f32 0.6931472, %v3082_v20 }
 0x234   : > { %1755 = vmatpush.msrb.mxu0 %v1659_v16  ;;  %v1651_v44 = vadd.f32 %v1622_v50, %v1523_v23  ;;  %v1583_v59 = vmul.f32 1.442695, %v1560_v42  ;;  %v1670_v50 = vld [vmem:[%s4480_s5 + $0x28] sm:$0xff] }
 0x235   : > { %v1509_v22 = vpop.f32.mrf.mxu3  ;;  %v1649_v19 = vadd.f32 %v1618_v17, %v1521_v24 }
 0x236   : > { %1756 = vmatpush.msrb.mxu0 %v1657_v55  ;;  %v4103_v7 = vadd.f32 %v1509_v22, %v4040_v54 }
 0x238   : > { %1757 = vmatpush.msrb.mxu0 %v1655_v37  ;;  %v1546_v54 = vand.u32 2147483647, %v4103_v7 }
 0x23a   : > { %1758 = vmatpush.msrb.mxu0 %v1653_v43 }
 0x23c   : > { %1759 = vmatpush.msrb.mxu0 %v1651_v44 }
 0x23d   : > { %v1512_v11 = vpop.f32.mrf.mxu3 }
 0x23e   : > { %1760 = vmatpush.msrb.mxu0 %v1649_v19  ;;  %v4100_v15 = vadd.f32 %v1512_v11, %v4038_v52  ;;  %v4121_v52 = vadd.f32 %v4083_v18, %v4048_v51  ;;  %v1562_v51 = vsub.f32 0.0, %v1546_v54  ;;  %v4138_v18 = vld [vmem:[%s4480_s5 + $0x10] sm:$0xff] }
 0x23f   : > { %2854 = vmatmul.msk.f32.vlgmr.msrb.gmra.mxu0 %vm1414_vm1, %v4095_v41 }
 0x240   : > { %v1548_v36 = vand.u32 2147483647, %v4100_v15  ;;  %v1542_v6 = vand.u32 2147483647, %v4121_v52  ;;  %v1587_v9 = vmul.f32 1.442695, %v1562_v51 }
 0x242   : > { %v1564_v46 = vsub.f32 0.0, %v1548_v36  ;;  %v1558_v12 = vsub.f32 0.0, %v1542_v6  ;;  %v1530_v6 = vmax.f32 %v4103_v7, 0.0 }
 0x244   : > { %v1591_v49 = vmul.f32 1.442695, %v1564_v46  ;;  %v1579_v1 = vmul.f32 1.442695, %v1558_v12  ;;  %v1524_v12 = vmax.f32 %v4128_v53, 0.0 }
 0x245   : > { %v1515_v33 = vpop.f32.mrf.mxu3 }
 0x246   : > { %v4115_v0 = vadd.f32 %v1515_v33, %v4036_v47 }
 0x247   : > { %2855 = vmatmul.msk.f32.gmra.mxu0 %vm1414_vm1, %v4108_v14 }
 0x248   : > { %v1550_v39 = vand.u32 2147483647, %v4115_v0  ;;  %v1534_v11 = vmax.f32 %v4115_v0, 0.0 }
 0x24a   : > { %v1566_v47 = vsub.f32 0.0, %v1550_v39  ;;  %v1532_v39 = vmax.f32 %v4100_v15, 0.0 }
 0x24c   : > { %v1595_v30 = vmul.f32 1.442695, %v1566_v47 }
 0x24d   : > { %v1518_v60 = vpop.f32.mrf.mxu3 }
 0x24e   : > { %v1519_v31 = vadd.f32 %v1518_v60, %v4034_v34  ;;  %3083 = vpow2.f32 %v1595_v30  ;;  %v4148_v34 = vld [vmem:[%s4480_s5 + $0x18] sm:$0xff]  ;;  %v1671_v30 = vld [vmem:[%s4480_s5 + $0x30] sm:$0xff] }
 0x24f   : > { %2856 = vmatmul.msk.f32.gmra.mxu0 %vm1414_vm1, %v4138_v18  ;;  %3085 = vpow2.f32 %v1591_v49  ;;  %v1528_v49 = vmax.f32 %v4111_v32, 0.0 }
 0x250   : > { %v1552_v29 = vand.u32 2147483647, %v1519_v31  ;;  %3087 = vpow2.f32 %v1587_v9  ;;  %v1536_v17 = vmax.f32 %v1519_v31, 0.0  ;;  %v1526_v31 = vmax.f32 %v4121_v52, 0.0  ;;  %v4191_v52 = vpop.permute.xlu1 %1683 }
 0x251   : > { %3089 = vpow2.f32 %v1583_v59  ;;  %v1522_v59 = vmax.f32 %v4132_v38, 0.0 }
 0x252   : > { %v1568_v61 = vsub.f32 0.0, %v1552_v29 }
 0x254   : > { %v1599_v63 = vmul.f32 1.442695, %v1568_v61  ;;  %v3084_v3 = vpop.eup %3083 }
 0x255   : > { %v3086_v21 = vpop.eup %3085  ;;  %v1614_v2 = vadd.f32 1.0, %v3084_v3 }
 0x256   : > { %3091 = vpow2.f32 %v1599_v63  ;;  %v3088_v57 = vpop.eup %3087  ;;  %v1612_v13 = vadd.f32 1.0, %v3086_v21 }
 0x257   : > { %2857 = vmatmul.msk.f32.gmra.mxu0 %vm1414_vm1, %v4148_v34  ;;  %3093 = vpow2.f32 %v1579_v1  ;;  %v3090_v45 = vpop.eup %3089  ;;  %v1610_v16 = vadd.f32 1.0, %v3088_v57 }
 0x258   : > { %3095 = vpow2.f32 %v1575_v5  ;;  %v1608_v48 = vadd.f32 1.0, %v3090_v45 }
 0x259   : > { %3097 = vpow2.f32 %v1571_v26  ;;  %v4197_v26 = vpop.permute.xlu0 %1693 }
 0x25a   : > { %3099 = vlog2.f32 %v1614_v2 }
 0x25b   : > { %3101 = vlog2.f32 %v1612_v13 }
 0x25c   : > { %v3092_v58 = vpop.eup %3091 }
 0x25d   : > { %v1616_v10 = vadd.f32 1.0, %v3092_v58  ;;  %v3094_v40 = vpop.eup %3093 }
 0x25e   : > { %v3096_v55 = vpop.eup %3095  ;;  %v1606_v8 = vadd.f32 1.0, %v3094_v40  ;;  %v4200_v40 = vpop.permute.xlu1 %1698 }
 0x25f   : > { %3103 = vlog2.f32 %v1616_v10  ;;  %2858 = vmatmul.msk.f32.gmra.mxu0 %vm1414_vm1, %v4155_v27  ;;  %v3098_v20 = vpop.eup %3097  ;;  %v1604_v28 = vadd.f32 1.0, %v3096_v55 }
 0x260   : > { %3105 = vlog2.f32 %v1610_v16  ;;  %v3100_v22 = vpop.eup %3099  ;;  %v1602_v43 = vadd.f32 1.0, %v3098_v20 }
 0x261   : > { %3107 = vlog2.f32 %v1608_v48  ;;  %v3102_v37 = vpop.eup %3101  ;;  %v1644_v44 = vmul.f32 0.6931472, %v3100_v22 }
 0x262   : > { %3109 = vlog2.f32 %v1606_v8  ;;  %v1640_v33 = vmul.f32 0.6931472, %v3102_v37 }
 0x263   : > { %3111 = vlog2.f32 %v1604_v28  ;;  %v1662_v4 = vadd.f32 %v1644_v44, %v1534_v11 }
 0x264   : > { %3113 = vlog2.f32 %v1602_v43  ;;  %v1660_v51 = vadd.f32 %v1640_v33, %v1532_v39 }
 0x265   : > { %v3104_v23 = vpop.eup %3103 }
 0x266   : > { %v1648_v24 = vmul.f32 0.6931472, %v3104_v23  ;;  %v3106_v19 = vpop.eup %3105 }
 0x267   : > { %2859 = vmatmul.msk.f32.gmra.mxu0 %vm1414_vm1, %v1670_v50  ;;  %v3108_v54 = vpop.eup %3107  ;;  %v1636_v46 = vmul.f32 0.6931472, %v3106_v19 }
 0x268   : > { %v1664_v36 = vadd.f32 %v1648_v24, %v1536_v17  ;;  %v3110_v47 = vpop.eup %3109  ;;  %v1632_v42 = vmul.f32 0.6931472, %v3108_v54  ;;  %v4206_v24 = vpop.permute.xlu2 %1703 }
 0x269   : > { %v3112_v0 = vpop.eup %3111  ;;  %v1658_v60 = vadd.f32 %v1636_v46, %v1530_v6  ;;  %v1628_v25 = vmul.f32 0.6931472, %v3110_v47 }
 0x26a   : > { %1794 = vmatpush.msrb.mxu1 %v1664_v36  ;;  %v3114_v15 = vpop.eup %3113  ;;  %v1656_v7 = vadd.f32 %v1632_v42, %v1528_v49  ;;  %v1624_v56 = vmul.f32 0.6931472, %v3112_v0 }
 0x26b   : > { %v1654_v9 = vadd.f32 %v1628_v25, %v1526_v31  ;;  %v1620_v29 = vmul.f32 0.6931472, %v3114_v15 }
 0x26c   : > { %1795 = vmatpush.msrb.mxu1 %v1662_v4  ;;  %v1652_v32 = vadd.f32 %v1624_v56, %v1524_v12 }
 0x26d   : > { %v1650_v61 = vadd.f32 %v1620_v29, %v1522_v59 }
 0x26e   : > { %1796 = vmatpush.msrb.mxu1 %v1660_v51  ;;  %v4212_v51 = vpop.permute.xlu1 %1708 }
 0x26f   : > { %2860 = vmatmul.msk.f32.gmra.mxu0 %vm1414_vm1, %v1671_v30 }
 0x270   : > { %1797 = vmatpush.msrb.mxu1 %v1658_v60 }
 0x272   : > { %1798 = vmatpush.msrb.mxu1 %v1656_v7 }
 0x274   : > { %1799 = vmatpush.msrb.mxu1 %v1654_v9  ;;  %v4218_v9 = vpop.permute.xlu2 %1713 }
 0x276   : > { %1800 = vmatpush.msrb.mxu1 %v1652_v32 }
 0x277   : > { %2861 = vmatmul.msk.f32.gmra.mxu0 %vm1414_vm1, %v1672_v35 }
 0x278   : > { %1801 = vmatpush.msrb.mxu1 %v1650_v61 }
 0x279   : > { %2862 = vmatmul.msk.f32.vlgmr.msrb.gmra.mxu1 %vm1414_vm1, %v4095_v41 }
 0x281   : > { %2863 = vmatmul.msk.f32.gmra.mxu1 %vm1414_vm1, %v4108_v14 }
 0x289   : > { %2864 = vmatmul.msk.f32.gmra.mxu1 %vm1414_vm1, %v4138_v18 }
 0x291   : > { %2865 = vmatmul.msk.f32.gmra.mxu1 %vm1414_vm1, %v4148_v34 }
 0x299   : > { %2866 = vmatmul.msk.f32.gmra.mxu1 %vm1414_vm1, %v4155_v27 }
 0x2a1   : > { %2867 = vmatmul.msk.f32.gmra.mxu1 %vm1414_vm1, %v1670_v50 }
 0x2a9   : > { %2868 = vmatmul.msk.f32.gmra.mxu1 %vm1414_vm1, %v1671_v30 }
 0x2b1   : > { %2869 = vmatmul.msk.f32.gmra.mxu1 %vm1414_vm1, %v1672_v35 }
 0x2bc   : > { %v1762_v41 = vpop.f32.mrf.mxu0 }
 0x2bd   : > { %v1763_v14 = vadd.f32 %v1762_v41, %v4191_v52 }
 0x2bf   : > { %v1843_v53 = vand.u32 2147483647, %v1763_v14  ;;  %v1827_v8 = vmax.f32 %v1763_v14, 0.0 }
 0x2c1   : > { %v1859_v38 = vsub.f32 0.0, %v1843_v53 }
 0x2c3   : > { %v1875_v18 = vmul.f32 1.442695, %v1859_v38 }
 0x2c4   : > { %v1765_v1 = vpop.f32.mrf.mxu0 }
 0x2c5   : > { %3115 = vpow2.f32 %v1875_v18  ;;  %v1766_v63 = vadd.f32 %v1765_v1, %v4194_v62 }
 0x2c7   : > { %v1845_v34 = vand.u32 2147483647, %v1766_v63  ;;  %v1829_v11 = vmax.f32 %v1766_v63, 0.0  ;;  %v4224_v63 = vpop.permute.xlu0 %1718 }
 0x2c9   : > { %v1861_v3 = vsub.f32 0.0, %v1845_v34 }
 0x2cb   : > { %v3116_v5 = vpop.eup %3115  ;;  %v1879_v21 = vmul.f32 1.442695, %v1861_v3 }
 0x2cc   : > { %v1907_v2 = vadd.f32 1.0, %v3116_v5  ;;  %v1768_v57 = vpop.f32.mrf.mxu0 }
 0x2cd   : > { %3117 = vpow2.f32 %v1879_v21  ;;  %v1769_v13 = vadd.f32 %v1768_v57, %v4197_v26 }
 0x2ce   : > { %3119 = vlog2.f32 %v1907_v2 }
 0x2cf   : > { %v1847_v45 = vand.u32 2147483647, %v1769_v13  ;;  %v1831_v0 = vmax.f32 %v1769_v13, 0.0 }
 0x2d1   : > { %v1863_v58 = vsub.f32 0.0, %v1847_v45 }
 0x2d3   : > { %v3118_v27 = vpop.eup %3117  ;;  %v1883_v16 = vmul.f32 1.442695, %v1863_v58 }
 0x2d4   : > { %v3120_v10 = vpop.eup %3119  ;;  %v1909_v48 = vadd.f32 1.0, %v3118_v27  ;;  %v1771_v55 = vpop.f32.mrf.mxu0 }
 0x2d5   : > { %3121 = vpow2.f32 %v1883_v16  ;;  %v1772_v20 = vadd.f32 %v1771_v55, %v4200_v40  ;;  %v1924_v22 = vmul.f32 0.6931472, %v3120_v10 }
 0x2d6   : > { %3123 = vlog2.f32 %v1909_v48 }
 0x2d7   : > { %v1849_v28 = vand.u32 2147483647, %v1772_v20  ;;  %v4203_v37 = vadd.f32 %v1924_v22, %v1827_v8  ;;  %v1833_v32 = vmax.f32 %v1772_v20, 0.0 }
 0x2d9   : > { %v1865_v50 = vsub.f32 0.0, %v1849_v28  ;;  %2045 = vxpose.xlu0.b32.start [1/8] (short) %v4203_v37, 128 }
 0x2db   : > { %v3122_v23 = vpop.eup %3121  ;;  %v1887_v43 = vmul.f32 1.442695, %v1865_v50 }
 0x2dc   : > { %v3124_v17 = vpop.eup %3123  ;;  %v1911_v44 = vadd.f32 1.0, %v3122_v23  ;;  %v1774_v19 = vpop.f32.mrf.mxu0 }
 0x2dd   : > { %v1928_v36 = vmul.f32 0.6931472, %v3124_v17  ;;  %3125 = vpow2.f32 %v1887_v43  ;;  %v1775_v33 = vadd.f32 %v1774_v19, %v4206_v24 }
 0x2de   : > { %3127 = vlog2.f32 %v1911_v44 }
 0x2df   : > { %v4209_v54 = vadd.f32 %v1928_v36, %v1829_v11  ;;  %v1851_v39 = vand.u32 2147483647, %v1775_v33  ;;  %v1835_v5 = vmax.f32 %v1775_v33, 0.0 }
 0x2e1   : > { %v1867_v4 = vsub.f32 0.0, %v1851_v39  ;;  %2046 = vxpose.xlu0.b32.cont [2/8] (short) %v4209_v54, 128 }
 0x2e3   : > { %v3126_v46 = vpop.eup %3125  ;;  %v1891_v47 = vmul.f32 1.442695, %v1867_v4 }
 0x2e4   : > { %v3128_v6 = vpop.eup %3127  ;;  %v1913_v30 = vadd.f32 1.0, %v3126_v46  ;;  %v1777_v42 = vpop.f32.mrf.mxu0 }
 0x2e5   : > { %v1932_v49 = vmul.f32 0.6931472, %v3128_v6  ;;  %3129 = vpow2.f32 %v1891_v47  ;;  %v1778_v60 = vadd.f32 %v1777_v42, %v4212_v51 }
 0x2e6   : > { %3131 = vlog2.f32 %v1913_v30 }
 0x2e7   : > { %v4215_v25 = vadd.f32 %v1932_v49, %v1831_v0  ;;  %v1853_v15 = vand.u32 2147483647, %v1778_v60  ;;  %v1837_v22 = vmax.f32 %v1778_v60, 0.0 }
 0x2e9   : > { %v1869_v31 = vsub.f32 0.0, %v1853_v15  ;;  %2047 = vxpose.xlu0.b32.cont [3/8] (short) %v4215_v25, 128 }
 0x2eb   : > { %v3130_v7 = vpop.eup %3129  ;;  %v1895_v56 = vmul.f32 1.442695, %v1869_v31 }
 0x2ec   : > { %v3132_v12 = vpop.eup %3131  ;;  %v1915_v29 = vadd.f32 1.0, %v3130_v7  ;;  %v1780_v59 = vpop.f32.mrf.mxu0 }
 0x2ed   : > { %v1936_v35 = vmul.f32 0.6931472, %v3132_v12  ;;  %3133 = vpow2.f32 %v1895_v56  ;;  %v1781_v61 = vadd.f32 %v1780_v59, %v4218_v9 }
 0x2ee   : > { %3135 = vlog2.f32 %v1915_v29 }
 0x2ef   : > { %v4221_v41 = vadd.f32 %v1936_v35, %v1833_v32  ;;  %v1855_v14 = vand.u32 2147483647, %v1781_v61  ;;  %v1839_v39 = vmax.f32 %v1781_v61, 0.0 }
 0x2f1   : > { %v1871_v53 = vsub.f32 0.0, %v1855_v14  ;;  %2048 = vxpose.xlu0.b32.cont [4/8] (short) %v4221_v41, 128 }
 0x2f3   : > { %v3134_v38 = vpop.eup %3133  ;;  %v1899_v18 = vmul.f32 1.442695, %v1871_v53 }
 0x2f4   : > { %v3136_v1 = vpop.eup %3135  ;;  %v1917_v34 = vadd.f32 1.0, %v3134_v38  ;;  %v1783_v3 = vpop.f32.mrf.mxu0 }
 0x2f5   : > { %v1940_v21 = vmul.f32 0.6931472, %v3136_v1  ;;  %3137 = vpow2.f32 %v1899_v18  ;;  %v1784_v2 = vadd.f32 %v1783_v3, %v4224_v63 }
 0x2f6   : > { %3139 = vlog2.f32 %v1917_v34  ;;  %v1803_v57 = vpop.f32.mrf.mxu1 }
 0x2f7   : > { %v4227_v13 = vadd.f32 %v1940_v21, %v1835_v5  ;;  %v1857_v45 = vand.u32 2147483647, %v1784_v2  ;;  %v1804_v58 = vadd.f32 %v1803_v57, %v4191_v52  ;;  %v1841_v15 = vmax.f32 %v1784_v2, 0.0 }
 0x2f9   : > { %v1873_v27 = vsub.f32 0.0, %v1857_v45  ;;  %v1844_v16 = vand.u32 2147483647, %v1804_v58  ;;  %2049 = vxpose.xlu0.b32.cont [5/8] (short) %v4227_v13, 128  ;;  %v1828_v12 = vmax.f32 %v1804_v58, 0.0 }
 0x2fb   : > { %v3138_v10 = vpop.eup %3137  ;;  %v1903_v48 = vmul.f32 1.442695, %v1873_v27  ;;  %v1860_v55 = vsub.f32 0.0, %v1844_v16 }
 0x2fc   : > { %v3140_v8 = vpop.eup %3139  ;;  %v1919_v20 = vadd.f32 1.0, %v3138_v10 }
 0x2fd   : > { %v1944_v28 = vmul.f32 0.6931472, %v3140_v8  ;;  %3141 = vpow2.f32 %v1903_v48  ;;  %v1877_v50 = vmul.f32 1.442695, %v1860_v55 }
 0x2fe   : > { %3143 = vlog2.f32 %v1919_v20  ;;  %v1806_v23 = vpop.f32.mrf.mxu1 }
 0x2ff   : > { %v1965_v43 = vadd.f32 %v1944_v28, %v1837_v22  ;;  %3145 = vpow2.f32 %v1877_v50  ;;  %v1807_v17 = vadd.f32 %v1806_v23, %v4194_v62 }
 0x301   : > { %v1846_v52 = vand.u32 2147483647, %v1807_v17  ;;  %2050 = vxpose.xlu0.b32.cont [6/8] (short) %v1965_v43, 128  ;;  %v1830_v5 = vmax.f32 %v1807_v17, 0.0 }
 0x303   : > { %v3142_v44 = vpop.eup %3141  ;;  %v1862_v19 = vsub.f32 0.0, %v1846_v52 }
 0x304   : > { %v3144_v11 = vpop.eup %3143  ;;  %v1921_v36 = vadd.f32 1.0, %v3142_v44 }
 0x305   : > { %v3146_v33 = vpop.eup %3145  ;;  %v1948_v4 = vmul.f32 0.6931472, %v3144_v11  ;;  %v1881_v46 = vmul.f32 1.442695, %v1862_v19 }
 0x306   : > { %v1908_v47 = vadd.f32 1.0, %v3146_v33  ;;  %v1809_v6 = vpop.f32.mrf.mxu1  ;;  %3147 = vlog2.f32 %v1921_v36 }
 0x307   : > { %v1967_v30 = vadd.f32 %v1948_v4, %v1839_v39  ;;  %3149 = vpow2.f32 %v1881_v46  ;;  %v1810_v42 = vadd.f32 %v1809_v6, %v4197_v26 }
 0x308   : > { %3151 = vlog2.f32 %v1908_v47 }
 0x309   : > { %v1848_v0 = vand.u32 2147483647, %v1810_v42  ;;  %2051 = vxpose.xlu0.b32.cont [7/8] (short) %v1967_v30, 128  ;;  %v1832_v48 = vmax.f32 %v1810_v42, 0.0 }
 0x30b   : > { %v1864_v62 = vsub.f32 0.0, %v1848_v0 }
 0x30c   : > { %v3148_v49 = vpop.eup %3147 }
 0x30d   : > { %v3150_v60 = vpop.eup %3149  ;;  %v1885_v31 = vmul.f32 1.442695, %v1864_v62  ;;  %v1952_v7 = vmul.f32 0.6931472, %v3148_v49 }
 0x30e   : > { %v3152_v56 = vpop.eup %3151  ;;  %v1910_v29 = vadd.f32 1.0, %v3150_v60  ;;  %v1812_v59 = vpop.f32.mrf.mxu1 }
 0x30f   : > { %3153 = vpow2.f32 %v1885_v31  ;;  %v1813_v32 = vadd.f32 %v1812_v59, %v4200_v40  ;;  %v1969_v35 = vadd.f32 %v1952_v7, %v1841_v15  ;;  %v1926_v61 = vmul.f32 0.6931472, %v3152_v56  ;;  %v2040_v7 = vld [vmem:[%s4484_s9 + $0x38] sm:$0xff] }
 0x310   : > { %3155 = vlog2.f32 %v1910_v29 }
 0x311   : > { %v1850_v26 = vand.u32 2147483647, %v1813_v32  ;;  %1990 = vmatpush.msra.mxu2 %v1969_v35  ;;  %2052 = vxpose.xlu0.b32.end [8/8] (short) %v1969_v35, 128  ;;  %v4234_v14 = vadd.f32 %v1926_v61, %v1828_v12 }
 0x313   : > { %v1866_v53 = vsub.f32 0.0, %v1850_v26  ;;  %2077 = vxpose.xlu1.b32.start [1/8] (short) %v4234_v14, 128  ;;  %1991 = vmatpush.msra.mxu2 %v1967_v30 }
 0x315   : > { %v3154_v38 = vpop.eup %3153  ;;  %v1889_v18 = vmul.f32 1.442695, %v1866_v53  ;;  %1992 = vmatpush.msra.mxu2 %v1965_v43  ;;  %v1834_v43 = vmax.f32 %v1813_v32, 0.0 }
 0x316   : > { %v3156_v1 = vpop.eup %3155  ;;  %v1912_v34 = vadd.f32 1.0, %v3154_v38  ;;  %v1815_v3 = vpop.f32.mrf.mxu1 }
 0x317   : > { %v1930_v40 = vmul.f32 0.6931472, %v3156_v1  ;;  %3157 = vpow2.f32 %v1889_v18  ;;  %v1816_v21 = vadd.f32 %v1815_v3, %v4206_v24  ;;  %1993 = vmatpush.msra.mxu2 %v4227_v13  ;;  %v4248_v24 = vld [vmem:[%s4482_s7] sm:$0x1]  ;;  %v2038_v18 = vld [vmem:[%s4484_s9 + $0x28] sm:$0xff]  ;;  %v2035_v3 = vld [vmem:[%s4484_s9 + $0x10] sm:$0xff] }
 0x318   : > { %3159 = vlog2.f32 %v1912_v34  ;;  %v2037_v1 = vld [vmem:[%s4484_s9 + $0x20] sm:$0xff]  ;;  %v2036_v34 = vld [vmem:[%s4484_s9 + $0x18] sm:$0xff] }
 0x319   : > { %v4239_v2 = vadd.f32 %v1930_v40, %v1830_v5  ;;  %v1852_v57 = vand.u32 2147483647, %v1816_v21  ;;  %1994 = vmatpush.msra.mxu2 %v4221_v41  ;;  %v1836_v4 = vmax.f32 %v1816_v21, 0.0  ;;  %v2034_v5 = vld [vmem:[%s4484_s9 + $0x8] sm:$0xff]  ;;  %v2033_v40 = vld [vmem:[%s4484_s9] sm:$0xff] }
 0x31b   : > { %v1868_v45 = vsub.f32 0.0, %v1852_v57  ;;  %2078 = vxpose.xlu1.b32.cont [2/8] (short) %v4239_v2, 128  ;;  %1995 = vmatpush.msra.mxu2 %v4215_v25 }
 0x31d   : > { %v3158_v58 = vpop.eup %3157  ;;  %v1893_v27 = vmul.f32 1.442695, %v1868_v45  ;;  %1996 = vmatpush.msra.mxu2 %v4209_v54 }
 0x31e   : > { %v3160_v13 = vpop.eup %3159  ;;  %v1914_v16 = vadd.f32 1.0, %v3158_v58  ;;  %v1818_v10 = vpop.f32.mrf.mxu1 }
 0x31f   : > { %v1934_v55 = vmul.f32 0.6931472, %v3160_v13  ;;  %3161 = vpow2.f32 %v1893_v27  ;;  %v1819_v41 = vadd.f32 %v1818_v10, %v4212_v51  ;;  %1997 = vmatpush.msra.mxu2 %v4203_v37 }
 0x320   : > { %3163 = vlog2.f32 %v1914_v16  ;;  %2870 = vmatmul.msk.f32.vlgmr.msra.gmra.mxu2 %vm1414_vm1, %v4248_v24 }
 0x321   : > { %v4254_v54 = vadd.f32 %v1934_v55, %v1832_v48  ;;  %v1854_v25 = vand.u32 2147483647, %v1819_v41  ;;  %v1838_v60 = vmax.f32 %v1819_v41, 0.0  ;;  %2213 = vmatpush.msrb.mxu2 %v2040_v7  ;;  %v1976_v55 = vpop.permute.xlu2 %1975 }
 0x322   : > { %v1978_v41 = vperm.slane %v1976_v55, 0 }
 0x323   : > { %v1870_v8 = vsub.f32 0.0, %v1854_v25  ;;  %2079 = vxpose.xlu1.b32.cont [3/8] (short) %v4254_v54, 128 }
 0x325   : > { %v3162_v20 = vpop.eup %3161  ;;  %v1897_v22 = vmul.f32 1.442695, %v1870_v8  ;;  %v2028_v8 = vlaneseq }
 0x326   : > { %v3164_v28 = vpop.eup %3163  ;;  %v1916_v50 = vadd.f32 1.0, %v3162_v20  ;;  %v1821_v23 = vpop.f32.mrf.mxu1 }
 0x327   : > { %v1938_v17 = vmul.f32 0.6931472, %v3164_v28  ;;  %3165 = vpow2.f32 %v1897_v22  ;;  %v1822_v37 = vadd.f32 %v1821_v23, %v4218_v9  ;;  %vm2030_vm3 = vcmp.lt.s32.totalorder %v2028_v8, 256 }
 0x328   : > { %3167 = vlog2.f32 %v1916_v50 }
 0x329   : > { %v1962_v51 = vadd.f32 %v1938_v17, %v1834_v43  ;;  %v1856_v52 = vand.u32 2147483647, %v1822_v37  ;;  %v1840_v59 = vmax.f32 %v1822_v37, 0.0 }
 0x32b   : > { %v1872_v44 = vsub.f32 0.0, %v1856_v52  ;;  %2080 = vxpose.xlu1.b32.cont [4/8] (short) %v1962_v51, 128 }
 0x32d   : > { %v3166_v19 = vpop.eup %3165  ;;  %v1901_v11 = vmul.f32 1.442695, %v1872_v44 }
 0x32e   : > { %v3168_v36 = vpop.eup %3167  ;;  %v1918_v33 = vadd.f32 1.0, %v3166_v19  ;;  %v1824_v39 = vpop.f32.mrf.mxu1 }
 0x32f   : > { %v1942_v46 = vmul.f32 0.6931472, %v3168_v36  ;;  %3169 = vpow2.f32 %v1901_v11  ;;  %v1825_v47 = vadd.f32 %v1824_v39, %v4224_v63  ;;  %v2039_v63 = vld [vmem:[%s4484_s9 + $0x30] sm:$0xff]  ;;  %v4316_v11 = vld [vmem:[%s4485_s10] ss:$0 sm:$0xff] }
 0x330   : > { %3171 = vlog2.f32 %v1918_v33  ;;  %2214 = vmatpush.msrb.mxu2 %v2039_v63 }
 0x331   : > { %v1964_v6 = vadd.f32 %v1942_v46, %v1836_v4  ;;  %v1858_v30 = vand.u32 2147483647, %v1825_v47  ;;  %v1842_v26 = vmax.f32 %v1825_v47, 0.0 }
 0x332   : > { %2215 = vmatpush.msrb.mxu2 %v2038_v18 }
 0x333   : > { %v1874_v42 = vsub.f32 0.0, %v1858_v30  ;;  %2081 = vxpose.xlu1.b32.cont [5/8] (short) %v1964_v6, 128 }
 0x334   : > { %2216 = vmatpush.msrb.mxu2 %v2037_v1 }
 0x335   : > { %v3170_v9 = vpop.eup %3169  ;;  %v1905_v0 = vmul.f32 1.442695, %v1874_v42 }
 0x336   : > { %v3172_v62 = vpop.eup %3171  ;;  %v1920_v49 = vadd.f32 1.0, %v3170_v9  ;;  %2217 = vmatpush.msrb.mxu2 %v2036_v34 }
 0x337   : > { %v1946_v15 = vmul.f32 0.6931472, %v3172_v62  ;;  %3173 = vpow2.f32 %v1905_v0 }
 0x338   : > { %3175 = vlog2.f32 %v1920_v49  ;;  %2218 = vmatpush.msrb.mxu2 %v2035_v3 }
 0x339   : > { %v1966_v31 = vadd.f32 %v1946_v15, %v1838_v60 }
 0x33a   : > { %2219 = vmatpush.msrb.mxu2 %v2034_v5 }
 0x33b   : > { %2082 = vxpose.xlu1.b32.cont [6/8] (short) %v1966_v31, 128 }
 0x33c   : > { %2220 = vmatpush.msrb.mxu2 %v2033_v40 }
 0x33d   : > { %v3174_v56 = vpop.eup %3173 }
 0x33e   : > { %v3176_v12 = vpop.eup %3175  ;;  %v1922_v29 = vadd.f32 1.0, %v3174_v56 }
 0x33f   : > { %v1950_v32 = vmul.f32 0.6931472, %v3176_v12 }
 0x340   : > { %3177 = vlog2.f32 %v1922_v29 }
 0x341   : > { %v1968_v35 = vadd.f32 %v1950_v32, %v1840_v59 }
 0x343   : > { %2083 = vxpose.xlu1.b32.cont [7/8] (short) %v1968_v35, 128 }
 0x346   : > { %v3178_v61 = vpop.eup %3177 }
 0x347   : > { %v1954_v53 = vmul.f32 0.6931472, %v3178_v61 }
 0x349   : > { %v1970_v38 = vadd.f32 %v1954_v53, %v1842_v26 }
 0x34b   : > { %2010 = vmatpush.msra.mxu3 %v1970_v38  ;;  %2084 = vxpose.xlu1.b32.end [8/8] (short) %v1970_v38, 128 }
 0x34d   : > { %2011 = vmatpush.msra.mxu3 %v1968_v35 }
 0x34f   : > { %2012 = vmatpush.msra.mxu3 %v1966_v31 }
 0x351   : > { %2013 = vmatpush.msra.mxu3 %v1964_v6 }
 0x353   : > { %2014 = vmatpush.msra.mxu3 %v1962_v51 }
 0x355   : > { %2015 = vmatpush.msra.mxu3 %v4254_v54 }
 0x357   : > { %2016 = vmatpush.msra.mxu3 %v4239_v2 }
 0x359   : > { %2017 = vmatpush.msra.mxu3 %v4234_v14 }
 0x35a   : > { %2871 = vmatmul.msk.f32.vlgmr.msra.gmra.mxu3 %vm1414_vm1, %v4248_v24 }
 0x37d   : > { %v2061_v14 = vpop.trf.xlu0 }
 0x37e   : > { %2872 = vmatmul.msk.f32.vlgmr.msrb.gmra.mxu2 %vm1414_vm1, %v2061_v14 }
 0x385   : > { %v2062_v21 = vpop.trf.xlu0 }
 0x386   : > { %2873 = vmatmul.msk.f32.gmra.mxu2 %vm1414_vm1, %v2062_v21 }
 0x38d   : > { %v2063_v2 = vpop.trf.xlu0 }
 0x38e   : > { %2874 = vmatmul.msk.f32.gmra.mxu2 %vm1414_vm1, %v2063_v2 }
 0x395   : > { %v2064_v57 = vpop.trf.xlu0 }
 0x396   : > { %2875 = vmatmul.msk.f32.gmra.mxu2 %vm1414_vm1, %v2064_v57 }
 0x39d   : > { %v2065_v45 = vpop.trf.xlu0 }
 0x39e   : > { %2876 = vmatmul.msk.f32.gmra.mxu2 %vm1414_vm1, %v2065_v45 }
 0x3a3   : > { %v1999_v54 = vpop.f32.mrf.mxu2 }
 0x3a4   : > { %v2000_v50 = vadd.f32 %v1999_v54, %v1978_v41 }
 0x3a5   : > { %v2066_v58 = vpop.trf.xlu0 }
 0x3a6   : > { %2877 = vmatmul.msk.f32.gmra.mxu2 %vm1414_vm1, %v2066_v58 }
 0x3ad   : > { %v2067_v27 = vpop.trf.xlu0 }
 0x3ae   : > { %2878 = vmatmul.msk.f32.gmra.mxu2 %vm1414_vm1, %v2067_v27 }
 0x3b5   : > { %v2068_v24 = vpop.trf.xlu0 }
 0x3b6   : > { %2879 = vmatmul.msk.f32.gmra.mxu2 %vm1414_vm1, %v2068_v24 }
 0x3b7   : > { %v2093_v25 = vpop.trf.xlu1 }
 0x3bd   : > { %v2069_v13 = vpop.trf.xlu0 }
 0x3be   : > { %2880 = vmatmul.msk.f32.gmra.mxu2 %vm1414_vm1, %v2069_v13 }
 0x3bf   : > { %v2094_v37 = vpop.trf.xlu1 }
 0x3c5   : > { %v2070_v16 = vpop.trf.xlu0 }
 0x3c6   : > { %2881 = vmatmul.msk.f32.gmra.mxu2 %vm1414_vm1, %v2070_v16 }
 0x3c7   : > { %v2095_v52 = vpop.trf.xlu1 }
 0x3cd   : > { %v2071_v10 = vpop.trf.xlu0 }
 0x3ce   : > { %2882 = vmatmul.msk.f32.gmra.mxu2 %vm1414_vm1, %v2071_v10 }
 0x3cf   : > { %v2096_v19 = vpop.trf.xlu1 }
 0x3d5   : > { %v2072_v48 = vpop.trf.xlu0 }
 0x3d6   : > { %2883 = vmatmul.msk.f32.gmra.mxu2 %vm1414_vm1, %v2072_v48 }
 0x3d7   : > { %v2097_v4 = vpop.trf.xlu1 }
 0x3dd   : > { %v2019_v20 = vpop.f32.mrf.mxu3  ;;  %v2073_v22 = vpop.trf.xlu0 }
 0x3de   : > { %v2020_v28 = vadd.f32 %v2019_v20, %v1978_v41  ;;  %2884 = vmatmul.msk.f32.gmra.mxu2 %vm1414_vm1, %v2073_v22 }
 0x3df   : > { %v2098_v0 = vpop.trf.xlu1 }
 0x3e0   : > { %v2024_v23 = vrot.slane %v2020_v28, 7 }
 0x3e2   : > { %v2026_v43 = vsel %vm2025_vm2, %v2000_v50, %v2024_v23 }
 0x3e3   : > { %2032 = vst.msk [vmem:[%s447_s8] sm:$0x3] %vm2030_vm3, %v2026_v43 }
 0x3e5   : > { %v2074_v17 = vpop.trf.xlu0 }
 0x3e6   : > { %2885 = vmatmul.msk.f32.gmra.mxu2 %vm1414_vm1, %v2074_v17 }
 0x3e7   : > { %v2099_v56 = vpop.trf.xlu1 }
 0x3ed   : > { %v2075_v51 = vpop.trf.xlu0 }
 0x3ee   : > { %2886 = vmatmul.msk.f32.gmra.mxu2 %vm1414_vm1, %v2075_v51 }
 0x3ef   : > { %v2100_v53 = vpop.trf.xlu1 }
 0x3f5   : > { %v2076_v44 = vpop.trf.xlu0 }
 0x3f6   : > { %2887 = vmatmul.msk.f32.gmra.mxu2 %vm1414_vm1, %v2076_v44 }
 0x3f7   : > { %v2101_v2 = vpop.trf.xlu1 }
 0x3fe   : > { %2888 = vmatmul.msk.f32.gmra.mxu2 %vm1414_vm1, %v2093_v25 }
 0x3ff   : > { %v2102_v10 = vpop.trf.xlu1 }
 0x401   : > { %v2222_v36 = vpop.f32.mrf.mxu2 }
 0x402   : > { %v2223_v33 = vadd.f32 %v4316_v11, %v2222_v36 }
 0x404   : > { %v2318_v39 = vmul.f32 0.5, %v2223_v33 }
 0x406   : > { %3179 = vtanh.f32 %v2318_v39  ;;  %2889 = vmatmul.msk.f32.gmra.mxu2 %vm1414_vm1, %v2094_v37 }
 0x407   : > { %v2103_v22 = vpop.trf.xlu1 }
 0x409   : > { %v2225_v46 = vpop.f32.mrf.mxu2 }
 0x40a   : > { %v2226_v47 = vadd.f32 %v4316_v11, %v2225_v46 }
 0x40c   : > { %v3180_v6 = vpop.eup %3179  ;;  %v2319_v30 = vmul.f32 0.5, %v2226_v47 }
 0x40d   : > { %v2382_v42 = vmul.f32 0.501, %v3180_v6 }
 0x40e   : > { %3181 = vtanh.f32 %v2319_v30  ;;  %2890 = vmatmul.msk.f32.gmra.mxu2 %vm1414_vm1, %v2095_v52 }
 0x40f   : > { %v2414_v9 = vadd.f32 0.5, %v2382_v42  ;;  %v2104_v52 = vpop.trf.xlu1 }
 0x411   : > { %2446 = vst.msk [vmem:[%s4325_s29] sm:$0xff] %vm542_vm0, %v2414_v9  ;;  %v2228_v62 = vpop.f32.mrf.mxu2 }
 0x412   : > { %v2229_v49 = vadd.f32 %v4316_v11, %v2228_v62 }
 0x414   : > { %v3182_v60 = vpop.eup %3181  ;;  %v2320_v15 = vmul.f32 0.5, %v2229_v49 }
 0x415   : > { %v2383_v31 = vmul.f32 0.501, %v3182_v60 }
 0x416   : > { %3183 = vtanh.f32 %v2320_v15  ;;  %2891 = vmatmul.msk.f32.gmra.mxu2 %vm1414_vm1, %v2096_v19 }
 0x417   : > { %v2415_v7 = vadd.f32 0.5, %v2383_v31  ;;  %v2105_v30 = vpop.trf.xlu1 }
 0x419   : > { %2447 = vst.msk [vmem:[%s4325_s29 + $0x8] sm:$0xff] %vm542_vm0, %v2415_v7  ;;  %v2231_v63 = vpop.f32.mrf.mxu2 }
 0x41a   : > { %v2232_v12 = vadd.f32 %v4316_v11, %v2231_v63 }
 0x41c   : > { %v3184_v29 = vpop.eup %3183  ;;  %v2321_v59 = vmul.f32 0.5, %v2232_v12 }
 0x41d   : > { %v2384_v32 = vmul.f32 0.501, %v3184_v29 }
 0x41e   : > { %3185 = vtanh.f32 %v2321_v59  ;;  %2892 = vmatmul.msk.f32.gmra.mxu2 %vm1414_vm1, %v2097_v4 }
 0x41f   : > { %v2416_v35 = vadd.f32 0.5, %v2384_v32  ;;  %v2106_v31 = vpop.trf.xlu1 }
 0x421   : > { %2448 = vst.msk [vmem:[%s4325_s29 + $0x10] sm:$0xff] %vm542_vm0, %v2416_v35  ;;  %v2234_v61 = vpop.f32.mrf.mxu2 }
 0x422   : > { %v2235_v26 = vadd.f32 %v4316_v11, %v2234_v61 }
 0x424   : > { %v3186_v38 = vpop.eup %3185  ;;  %v2322_v18 = vmul.f32 0.5, %v2235_v26 }
 0x425   : > { %v2385_v1 = vmul.f32 0.501, %v3186_v38 }
 0x426   : > { %3187 = vtanh.f32 %v2322_v18  ;;  %2893 = vmatmul.msk.f32.gmra.mxu2 %vm1414_vm1, %v2098_v0 }
 0x427   : > { %v2417_v34 = vadd.f32 0.5, %v2385_v1  ;;  %v2107_v35 = vpop.trf.xlu1 }
 0x429   : > { %2449 = vst.msk [vmem:[%s4325_s29 + $0x18] sm:$0xff] %vm542_vm0, %v2417_v34  ;;  %v2237_v3 = vpop.f32.mrf.mxu2 }
 0x42a   : > { %v2238_v5 = vadd.f32 %v4316_v11, %v2237_v3 }
 0x42c   : > { %v3188_v40 = vpop.eup %3187  ;;  %v2323_v14 = vmul.f32 0.5, %v2238_v5 }
 0x42d   : > { %v2386_v21 = vmul.f32 0.501, %v3188_v40 }
 0x42e   : > { %3189 = vtanh.f32 %v2323_v14  ;;  %2894 = vmatmul.msk.f32.gmra.mxu2 %vm1414_vm1, %v2099_v56 }
 0x42f   : > { %v2418_v57 = vadd.f32 0.5, %v2386_v21  ;;  %v2108_v3 = vpop.trf.xlu1 }
 0x431   : > { %2450 = vst.msk [vmem:[%s4325_s29 + $0x20] sm:$0xff] %vm542_vm0, %v2418_v57  ;;  %v2240_v45 = vpop.f32.mrf.mxu2 }
 0x432   : > { %v2241_v58 = vadd.f32 %v4316_v11, %v2240_v45 }
 0x434   : > { %v3190_v27 = vpop.eup %3189  ;;  %v2324_v24 = vmul.f32 0.5, %v2241_v58 }
 0x435   : > { %v2387_v13 = vmul.f32 0.501, %v3190_v27 }
 0x436   : > { %3191 = vtanh.f32 %v2324_v24  ;;  %2895 = vmatmul.msk.f32.gmra.mxu2 %vm1414_vm1, %v2100_v53 }
 0x437   : > { %v2419_v16 = vadd.f32 0.5, %v2387_v13 }
 0x439   : > { %2451 = vst.msk [vmem:[%s4325_s29 + $0x28] sm:$0xff] %vm542_vm0, %v2419_v16  ;;  %v2243_v48 = vpop.f32.mrf.mxu2 }
 0x43a   : > { %v2244_v55 = vadd.f32 %v4316_v11, %v2243_v48 }
 0x43c   : > { %v3192_v41 = vpop.eup %3191  ;;  %v2325_v54 = vmul.f32 0.5, %v2244_v55 }
 0x43d   : > { %v2388_v25 = vmul.f32 0.501, %v3192_v41 }
 0x43e   : > { %3193 = vtanh.f32 %v2325_v54  ;;  %2896 = vmatmul.msk.f32.gmra.mxu2 %vm1414_vm1, %v2101_v2 }
 0x43f   : > { %v2420_v8 = vadd.f32 0.5, %v2388_v25 }
 0x441   : > { %2452 = vst.msk [vmem:[%s4325_s29 + $0x30] sm:$0xff] %vm542_vm0, %v2420_v8  ;;  %v2246_v20 = vpop.f32.mrf.mxu2 }
 0x442   : > { %v2247_v28 = vadd.f32 %v4316_v11, %v2246_v20 }
 0x444   : > { %v3194_v50 = vpop.eup %3193  ;;  %v2326_v23 = vmul.f32 0.5, %v2247_v28 }
 0x445   : > { %v2389_v43 = vmul.f32 0.501, %v3194_v50 }
 0x446   : > { %3195 = vtanh.f32 %v2326_v23  ;;  %2897 = vmatmul.msk.f32.gmra.mxu2 %vm1414_vm1, %v2102_v10 }
 0x447   : > { %v2421_v17 = vadd.f32 0.5, %v2389_v43 }
 0x449   : > { %2453 = vst.msk [vmem:[%s4325_s29 + $0x38] sm:$0xff] %vm542_vm0, %v2421_v17  ;;  %v2249_v37 = vpop.f32.mrf.mxu2 }
 0x44a   : > { %v2250_v51 = vadd.f32 %v4316_v11, %v2249_v37 }
 0x44c   : > { %v3196_v44 = vpop.eup %3195  ;;  %v2327_v19 = vmul.f32 0.5, %v2250_v51 }
 0x44d   : > { %v2390_v36 = vmul.f32 0.501, %v3196_v44 }
 0x44e   : > { %3197 = vtanh.f32 %v2327_v19  ;;  %2898 = vmatmul.msk.f32.gmra.mxu2 %vm1414_vm1, %v2103_v22 }
 0x44f   : > { %v2422_v33 = vadd.f32 0.5, %v2390_v36 }
 0x451   : > { %2454 = vst.msk [vmem:[%s4325_s29 + $0x40] sm:$0xff] %vm542_vm0, %v2422_v33  ;;  %v2252_v39 = vpop.f32.mrf.mxu2 }
 0x452   : > { %v2253_v4 = vadd.f32 %v4316_v11, %v2252_v39 }
 0x454   : > { %v3198_v46 = vpop.eup %3197  ;;  %v2328_v47 = vmul.f32 0.5, %v2253_v4 }
 0x455   : > { %v2391_v6 = vmul.f32 0.501, %v3198_v46 }
 0x456   : > { %3199 = vtanh.f32 %v2328_v47  ;;  %2899 = vmatmul.msk.f32.gmra.mxu2 %vm1414_vm1, %v2104_v52 }
 0x457   : > { %v2423_v42 = vadd.f32 0.5, %v2391_v6 }
 0x459   : > { %2455 = vst.msk [vmem:[%s4325_s29 + $0x48] sm:$0xff] %vm542_vm0, %v2423_v42  ;;  %v2255_v9 = vpop.f32.mrf.mxu2 }
 0x45a   : > { %v2256_v0 = vadd.f32 %v4316_v11, %v2255_v9 }
 0x45c   : > { %v3200_v62 = vpop.eup %3199  ;;  %v2329_v49 = vmul.f32 0.5, %v2256_v0 }
 0x45d   : > { %v2392_v60 = vmul.f32 0.501, %v3200_v62 }
 0x45e   : > { %3201 = vtanh.f32 %v2329_v49  ;;  %2900 = vmatmul.msk.f32.gmra.mxu2 %vm1414_vm1, %v2105_v30 }
 0x45f   : > { %v2424_v15 = vadd.f32 0.5, %v2392_v60 }
 0x461   : > { %2456 = vst.msk [vmem:[%s4325_s29 + $0x50] sm:$0xff] %vm542_vm0, %v2424_v15  ;;  %v2258_v7 = vpop.f32.mrf.mxu2 }
 0x462   : > { %v2259_v63 = vadd.f32 %v4316_v11, %v2258_v7 }
 0x464   : > { %v3202_v56 = vpop.eup %3201  ;;  %v2330_v12 = vmul.f32 0.5, %v2259_v63 }
 0x465   : > { %v2393_v29 = vmul.f32 0.501, %v3202_v56 }
 0x466   : > { %3203 = vtanh.f32 %v2330_v12  ;;  %2901 = vmatmul.msk.f32.gmra.mxu2 %vm1414_vm1, %v2106_v31 }
 0x467   : > { %v2425_v59 = vadd.f32 0.5, %v2393_v29 }
 0x469   : > { %2457 = vst.msk [vmem:[%s4325_s29 + $0x58] sm:$0xff] %vm542_vm0, %v2425_v59  ;;  %v2261_v32 = vpop.f32.mrf.mxu2 }
 0x46a   : > { %v2262_v61 = vadd.f32 %v4316_v11, %v2261_v32 }
 0x46c   : > { %v3204_v26 = vpop.eup %3203  ;;  %v2331_v53 = vmul.f32 0.5, %v2262_v61 }
 0x46d   : > { %v2394_v38 = vmul.f32 0.501, %v3204_v26 }
 0x46e   : > { %3205 = vtanh.f32 %v2331_v53  ;;  %2902 = vmatmul.msk.f32.gmra.mxu2 %vm1414_vm1, %v2107_v35 }
 0x46f   : > { %v2426_v18 = vadd.f32 0.5, %v2394_v38 }
 0x471   : > { %2458 = vst.msk [vmem:[%s4325_s29 + $0x60] sm:$0xff] %vm542_vm0, %v2426_v18  ;;  %v2264_v1 = vpop.f32.mrf.mxu2 }
 0x472   : > { %v2265_v34 = vadd.f32 %v4316_v11, %v2264_v1 }
 0x474   : > { %v3206_v5 = vpop.eup %3205  ;;  %v2332_v40 = vmul.f32 0.5, %v2265_v34 }
 0x475   : > { %v2395_v14 = vmul.f32 0.501, %v3206_v5 }
 0x476   : > { %3207 = vtanh.f32 %v2332_v40  ;;  %2903 = vmatmul.msk.f32.gmra.mxu2 %vm1414_vm1, %v2108_v3 }
 0x477   : > { %v2427_v21 = vadd.f32 0.5, %v2395_v14 }
 0x479   : > { %2459 = vst.msk [vmem:[%s4325_s29 + $0x68] sm:$0xff] %vm542_vm0, %v2427_v21  ;;  %v2267_v2 = vpop.f32.mrf.mxu2 }
 0x47a   : > { %v2268_v57 = vadd.f32 %v4316_v11, %v2267_v2 }
 0x47c   : > { %v3208_v45 = vpop.eup %3207  ;;  %v2333_v58 = vmul.f32 0.5, %v2268_v57 }
 0x47d   : > { %v2396_v27 = vmul.f32 0.501, %v3208_v45 }
 0x47e   : > { %3209 = vtanh.f32 %v2333_v58 }
 0x47f   : > { %v2428_v24 = vadd.f32 0.5, %v2396_v27 }
 0x481   : > { %2460 = vst.msk [vmem:[%s4325_s29 + $0x70] sm:$0xff] %vm542_vm0, %v2428_v24  ;;  %v2270_v13 = vpop.f32.mrf.mxu2 }
 0x482   : > { %v2271_v16 = vadd.f32 %v4316_v11, %v2270_v13 }
 0x484   : > { %v3210_v10 = vpop.eup %3209  ;;  %v2334_v48 = vmul.f32 0.5, %v2271_v16 }
 0x485   : > { %v2397_v55 = vmul.f32 0.501, %v3210_v10 }
 0x486   : > { %3211 = vtanh.f32 %v2334_v48 }
 0x487   : > { %v2429_v41 = vadd.f32 0.5, %v2397_v55 }
 0x489   : > { %2461 = vst.msk [vmem:[%s4325_s29 + $0x78] sm:$0xff] %vm542_vm0, %v2429_v41  ;;  %v2273_v54 = vpop.f32.mrf.mxu2 }
 0x48a   : > { %v2274_v25 = vadd.f32 %v4316_v11, %v2273_v54 }
 0x48c   : > { %v3212_v8 = vpop.eup %3211  ;;  %v2335_v20 = vmul.f32 0.5, %v2274_v25 }
 0x48d   : > { %3270 = shalt.err (!%p3267_p5)
}
 0x48e   : > { %2926 = dma.vmem_to_hbm [thread:$0]  (%p3432_p4), %s2507_s19, 32, %s2509_s20, %s2488_s1   ;;  %v2398_v22 = vmul.f32 0.501, %v3212_v8  ;;  %3213 = vtanh.f32 %v2335_v20 }
 0x490   : > { %v2430_v28 = vadd.f32 0.5, %v2398_v22 }
 0x491   : > { %v2276_v50 = vpop.f32.mrf.mxu2 }
 0x492   : > { %2462 = vst.msk [vmem:[%s4325_s29 + $0x80] sm:$0xff] %vm542_vm0, %v2430_v28  ;;  %v2277_v23 = vadd.f32 %v4316_v11, %v2276_v50 }
 0x494   : > { %v3214_v43 = vpop.eup %3213  ;;  %v2336_v17 = vmul.f32 0.5, %v2277_v23 }
 0x495   : > { %v2399_v37 = vmul.f32 0.501, %v3214_v43 }
 0x496   : > { %3215 = vtanh.f32 %v2336_v17 }
 0x497   : > { %v2431_v51 = vadd.f32 0.5, %v2399_v37 }
 0x499   : > { %2463 = vst.msk [vmem:[%s4325_s29 + $0x88] sm:$0xff] %vm542_vm0, %v2431_v51  ;;  %v2279_v52 = vpop.f32.mrf.mxu2 }
 0x49a   : > { %v2280_v44 = vadd.f32 %v4316_v11, %v2279_v52 }
 0x49c   : > { %v3216_v19 = vpop.eup %3215  ;;  %v2337_v36 = vmul.f32 0.5, %v2280_v44 }
 0x49d   : > { %v2400_v33 = vmul.f32 0.501, %v3216_v19 }
 0x49e   : > { %3217 = vtanh.f32 %v2337_v36 }
 0x49f   : > { %v2432_v39 = vadd.f32 0.5, %v2400_v33 }
 0x4a1   : > { %2464 = vst.msk [vmem:[%s4325_s29 + $0x90] sm:$0xff] %vm542_vm0, %v2432_v39  ;;  %v2282_v4 = vpop.f32.mrf.mxu2 }
 0x4a2   : > { %v2283_v46 = vadd.f32 %v4316_v11, %v2282_v4 }
 0x4a4   : > { %v3218_v47 = vpop.eup %3217  ;;  %v2338_v6 = vmul.f32 0.5, %v2283_v46 }
 0x4a5   : > { %v2401_v30 = vmul.f32 0.501, %v3218_v47 }
 0x4a6   : > { %3219 = vtanh.f32 %v2338_v6 }
 0x4a7   : > { %v2433_v42 = vadd.f32 0.5, %v2401_v30 }
 0x4a9   : > { %2465 = vst.msk [vmem:[%s4325_s29 + $0x98] sm:$0xff] %vm542_vm0, %v2433_v42  ;;  %v2285_v9 = vpop.f32.mrf.mxu2 }
 0x4aa   : > { %v2286_v0 = vadd.f32 %v4316_v11, %v2285_v9 }
 0x4ac   : > { %v3220_v62 = vpop.eup %3219  ;;  %v2339_v49 = vmul.f32 0.5, %v2286_v0 }
 0x4ad   : > { %v2402_v60 = vmul.f32 0.501, %v3220_v62 }
 0x4ae   : > { %3221 = vtanh.f32 %v2339_v49 }
 0x4af   : > { %v2434_v15 = vadd.f32 0.5, %v2402_v60 }
 0x4b1   : > { %2466 = vst.msk [vmem:[%s4325_s29 + $0xa0] sm:$0xff] %vm542_vm0, %v2434_v15  ;;  %v2288_v31 = vpop.f32.mrf.mxu2 }
 0x4b2   : > { %v2289_v7 = vadd.f32 %v4316_v11, %v2288_v31 }
 0x4b4   : > { %v3222_v63 = vpop.eup %3221  ;;  %v2340_v56 = vmul.f32 0.5, %v2289_v7 }
 0x4b5   : > { %v2403_v12 = vmul.f32 0.501, %v3222_v63 }
 0x4b6   : > { %3223 = vtanh.f32 %v2340_v56 }
 0x4b7   : > { %v2435_v29 = vadd.f32 0.5, %v2403_v12 }
 0x4b9   : > { %2467 = vst.msk [vmem:[%s4325_s29 + $0xa8] sm:$0xff] %vm542_vm0, %v2435_v29  ;;  %v2291_v59 = vpop.f32.mrf.mxu2 }
 0x4ba   : > { %v2292_v32 = vadd.f32 %v4316_v11, %v2291_v59 }
 0x4bc   : > { %v3224_v35 = vpop.eup %3223  ;;  %v2341_v61 = vmul.f32 0.5, %v2292_v32 }
 0x4bd   : > { %v2404_v26 = vmul.f32 0.501, %v3224_v35 }
 0x4be   : > { %3225 = vtanh.f32 %v2341_v61 }
 0x4bf   : > { %v2436_v53 = vadd.f32 0.5, %v2404_v26 }
 0x4c1   : > { %2468 = vst.msk [vmem:[%s4325_s29 + $0xb0] sm:$0xff] %vm542_vm0, %v2436_v53  ;;  %v2294_v38 = vpop.f32.mrf.mxu2 }
 0x4c2   : > { %v2295_v18 = vadd.f32 %v4316_v11, %v2294_v38 }
 0x4c4   : > { %v3226_v1 = vpop.eup %3225  ;;  %v2342_v34 = vmul.f32 0.5, %v2295_v18 }
 0x4c5   : > { %v2405_v3 = vmul.f32 0.501, %v3226_v1 }
 0x4c6   : > { %3227 = vtanh.f32 %v2342_v34 }
 0x4c7   : > { %v2437_v5 = vadd.f32 0.5, %v2405_v3 }
 0x4c9   : > { %2469 = vst.msk [vmem:[%s4325_s29 + $0xb8] sm:$0xff] %vm542_vm0, %v2437_v5  ;;  %v2297_v40 = vpop.f32.mrf.mxu2 }
 0x4ca   : > { %v2298_v14 = vadd.f32 %v4316_v11, %v2297_v40 }
 0x4cc   : > { %v3228_v21 = vpop.eup %3227  ;;  %v2343_v2 = vmul.f32 0.5, %v2298_v14 }
 0x4cd   : > { %v2406_v57 = vmul.f32 0.501, %v3228_v21 }
 0x4ce   : > { %3229 = vtanh.f32 %v2343_v2 }
 0x4cf   : > { %v2438_v45 = vadd.f32 0.5, %v2406_v57 }
 0x4d1   : > { %2470 = vst.msk [vmem:[%s4325_s29 + $0xc0] sm:$0xff] %vm542_vm0, %v2438_v45  ;;  %v2300_v58 = vpop.f32.mrf.mxu2 }
 0x4d2   : > { %v2301_v27 = vadd.f32 %v4316_v11, %v2300_v58 }
 0x4d4   : > { %v3230_v24 = vpop.eup %3229  ;;  %v2344_v13 = vmul.f32 0.5, %v2301_v27 }
 0x4d5   : > { %v2407_v16 = vmul.f32 0.501, %v3230_v24 }
 0x4d6   : > { %3231 = vtanh.f32 %v2344_v13 }
 0x4d7   : > { %v2439_v10 = vadd.f32 0.5, %v2407_v16 }
 0x4d9   : > { %2471 = vst.msk [vmem:[%s4325_s29 + $0xc8] sm:$0xff] %vm542_vm0, %v2439_v10  ;;  %v2303_v48 = vpop.f32.mrf.mxu2 }
 0x4da   : > { %v2304_v55 = vadd.f32 %v4316_v11, %v2303_v48 }
 0x4dc   : > { %v3232_v41 = vpop.eup %3231  ;;  %v2345_v54 = vmul.f32 0.5, %v2304_v55 }
 0x4dd   : > { %v2408_v25 = vmul.f32 0.501, %v3232_v41 }
 0x4de   : > { %3233 = vtanh.f32 %v2345_v54 }
 0x4df   : > { %v2440_v8 = vadd.f32 0.5, %v2408_v25 }
 0x4e1   : > { %2472 = vst.msk [vmem:[%s4325_s29 + $0xd0] sm:$0xff] %vm542_vm0, %v2440_v8  ;;  %v2306_v20 = vpop.f32.mrf.mxu2 }
 0x4e2   : > { %v2307_v22 = vadd.f32 %v4316_v11, %v2306_v20 }
 0x4e4   : > { %v3234_v28 = vpop.eup %3233  ;;  %v2346_v50 = vmul.f32 0.5, %v2307_v22 }
 0x4e5   : > { %v2409_v23 = vmul.f32 0.501, %v3234_v28 }
 0x4e6   : > { %3235 = vtanh.f32 %v2346_v50 }
 0x4e7   : > { %v2441_v43 = vadd.f32 0.5, %v2409_v23 }
 0x4e9   : > { %2473 = vst.msk [vmem:[%s4325_s29 + $0xd8] sm:$0xff] %vm542_vm0, %v2441_v43  ;;  %v2309_v17 = vpop.f32.mrf.mxu2 }
 0x4ea   : > { %v2310_v37 = vadd.f32 %v4316_v11, %v2309_v17 }
 0x4ec   : > { %v3236_v51 = vpop.eup %3235  ;;  %v2347_v52 = vmul.f32 0.5, %v2310_v37 }
 0x4ed   : > { %v2410_v44 = vmul.f32 0.501, %v3236_v51 }
 0x4ee   : > { %3237 = vtanh.f32 %v2347_v52 }
 0x4ef   : > { %v2442_v19 = vadd.f32 0.5, %v2410_v44 }
 0x4f1   : > { %2474 = vst.msk [vmem:[%s4325_s29 + $0xe0] sm:$0xff] %vm542_vm0, %v2442_v19  ;;  %v2312_v36 = vpop.f32.mrf.mxu2 }
 0x4f2   : > { %v2313_v33 = vadd.f32 %v4316_v11, %v2312_v36 }
 0x4f4   : > { %v3238_v39 = vpop.eup %3237  ;;  %v2348_v4 = vmul.f32 0.5, %v2313_v33 }
 0x4f5   : > { %v2411_v46 = vmul.f32 0.501, %v3238_v39 }
 0x4f6   : > { %3239 = vtanh.f32 %v2348_v4 }
 0x4f7   : > { %v2443_v47 = vadd.f32 0.5, %v2411_v46 }
 0x4f9   : > { %2475 = vst.msk [vmem:[%s4325_s29 + $0xe8] sm:$0xff] %vm542_vm0, %v2443_v47  ;;  %v2315_v6 = vpop.f32.mrf.mxu2 }
 0x4fa   : > { %v2316_v30 = vadd.f32 %v4316_v11, %v2315_v6 }
 0x4fc   : > { %v3240_v42 = vpop.eup %3239  ;;  %v2349_v9 = vmul.f32 0.5, %v2316_v30 }
 0x4fd   : > { %v2412_v0 = vmul.f32 0.501, %v3240_v42 }
 0x4fe   : > { %3241 = vtanh.f32 %v2349_v9 }
 0x4ff   : > { %v2444_v62 = vadd.f32 0.5, %v2412_v0 }
 0x501   : > { %2476 = vst.msk [vmem:[%s4325_s29 + $0xf0] sm:$0xff] %vm542_vm0, %v2444_v62 }
 0x504   : > { %v3242_v49 = vpop.eup %3241 }
 0x505   : > { %v2413_v60 = vmul.f32 0.501, %v3242_v49 }
 0x507   : > { %v2445_v15 = vadd.f32 0.5, %v2413_v60 }
 0x509   : > { %2477 = vst.msk [vmem:[%s4325_s29 + $0xf8] sm:$0xff] %vm542_vm0, %v2445_v15 }
 0x50a PF: > { %p2932_p4 = scmp.ge.s32.totalorder %s3321_s28, 2  ;;  %s2532_s0 = sand.u32 1, %s3301_s23  }
 0x50b   : > { %s2533_s1 = scalar_lea.sflag [#allocation4], %s2532_s0 }
 0x50c   : > { %p2929_p6 = pnand %p2932_p4, %p3439_p8 }
 0x50e   : > { %p2930_p7 = pneg %p2929_p6 }
 0x510   : > { %3296 = dma.done.wait (%p2930_p7), %s2533_s1, 32  }
 0x511   : > { %3298 = vsyncadd (%p2930_p7), %s2533_s1, 4294967264  ;;  %s28_s28 = sadd.s32 1, %s3321_s28   ;;  %s4498_s23 = smov %s3305_s24 }
 0x512   : > { %p25_p9 = scmp.ge.s32.totalorder %s28_s28, 4   ;;  %s4499_s24 = smov %s3309_s25 }
 0x513   : > { %s4500_s25 = smov %s3445_s17  ;;  %s4501_s26 = smov %s3317_s27 }
 0x514   : > { %s4502_s27 = smov %s4504_s30  ;;  %27 = sbr.rel (!%p25_p9) target bundleno = 8 (0x8), region = 113 }
 0x519   :  { %2539 = vsyncpa [#allocation4], 1 }
 0x51a   :  { %2541 = vsyncpa [#allocation4 + $0x1], 1 }

</bundles_post_ra>
